<compile_context>
chip_gen: v7x
topology: tpu7x:2x2x1
jax: 0.10.0
libtpu: 0.0.40
codegen_flags: <defaults>
</compile_context>

<pallas_src>
import jax
import jax.numpy as jnp
from jax.experimental import pallas as pl
from jax.experimental.pallas import tpu as pltpu

EPS = 1e-5  # nn.InstanceNorm2d default eps (affine=False, biased variance)


def _round_up(v, m):
    return (v + m - 1) // m * m


# ----------------------------- Pallas kernel -------------------------------

def _make_kernel(C, H, W, Sr, Lout, off0, cdt):
    """Fused ResNetBlock kernel for one batch image.

    Layout: activations are (C, L) with C on sublanes and flattened spatial on
    lanes.  Row-flat images use row stride Sr (valid pixels at h*Sr + w, w<W);
    reflect-padded images live in the pad scratch at base offset off0 with the
    same row stride (off0 chosen so the interior bulk store is 128-aligned).
    """
    inv_hw = 1.0 / float(H * W)
    Lr = Lout + 2  # slab width: covers the dw = 0..2 lane shifts

    def kernel(x_ref, w1_ref, w2_ref, col_ref, o_ref, pad_ref):
        col = col_ref[...]                      # (1, Lout) int32, col-within-row
        valid = col < W                         # real (h, w) output columns
        is_l = col == 0                         # left reflected padded column
        is_r = col == (W + 1)                   # right reflected padded column

        def reflect_pad(y):
            """Reflect-pad a row-flat (C, Lout) image into pad_ref.

            3 lane rolls + 2 selects build the horizontally padded row content;
            3 bulk stores place interior rows (aligned at off0 + Sr) and the two
            vertically reflected rows.  No per-row loop, no zero-init.
            """
            a = jnp.roll(y, 1, axis=1)          # a[:, j] = y[:, j-1]  interior
            b = jnp.roll(y, -1, axis=1)         # b[:, j] = y[:, j+1]  left col
            c = jnp.roll(y, 3, axis=1)          # c[:, j] = y[:, j-3]  right col
            content = jnp.where(is_l, b, jnp.where(is_r, c, a))       # (C, Lout)
            pad_ref[:, off0 + Sr: off0 + Sr + Lout] = content         # rows 1..H
            pad_ref[:, off0: off0 + Sr] = content[:, Sr:2 * Sr]       # top row
            pad_ref[:, off0 + (H + 1) * Sr: off0 + (H + 2) * Sr] = (
                content[:, (H - 2) * Sr:(H - 1) * Sr])                # bottom row

        def conv3x3(w_ref):
            """3x3 conv = 3 MXU matmuls with K = 3C (dh folded into contraction)."""
            slab = jnp.concatenate(
                [pad_ref[:, off0 + k * Sr: off0 + k * Sr + Lr] for k in range(3)],
                axis=0)                                               # (3C, Lout+2)
            shifted = [slab[:, dw:dw + Lout] for dw in range(3)]      # 3 x (3C, Lout)
            acc = jnp.dot(w_ref[0], shifted[0], preferred_element_type=jnp.float32)
            acc = acc + jnp.dot(w_ref[1], shifted[1], preferred_element_type=jnp.float32)
            acc = acc + jnp.dot(w_ref[2], shifted[2], preferred_element_type=jnp.float32)
            return acc, shifted[1]

        def inorm(acc):
            """Masked two-pass instance norm (biased variance), all f32."""
            am = jnp.where(valid, acc, 0.0)
            mean = jnp.sum(am, axis=1, keepdims=True) * inv_hw
            d = jnp.where(valid, acc - mean, 0.0)
            var = jnp.sum(d * d, axis=1, keepdims=True) * inv_hw
            return (acc - mean) * jax.lax.rsqrt(var + EPS)

        # ---- layer 1: reflect-pad -> conv3x3 -> instance norm -> relu ----
        reflect_pad(x_ref[0])
        acc1, s1 = conv3x3(w1_ref)
        res = s1[C:2 * C, :].astype(jnp.float32)   # tap (1,1) slice == original x
        y1 = jnp.maximum(inorm(acc1), 0.0)

        # ---- layer 2: reflect-pad -> conv3x3 -> instance norm (scratch reused) ----
        reflect_pad(y1.astype(cdt))
        acc2, _ = conv3x3(w2_ref)
        y2 = inorm(acc2)

        # ---- residual add + relu, lane-dense f32 store ----
        o_ref[0] = jnp.maximum(res + y2, 0.0).astype(o_ref.dtype)

    return kernel


# ------------------------------ JAX wrapper ---------------------------------

def resnet_block_forward(x_nchw, w1_oihw, w2_oihw, kernel_size=3,
                         compute_dtype=jnp.bfloat16):
    """Forward pass of ResNetBlock. x: (N, C, H, W); weights: (C, C, 3, 3)."""
    if kernel_size != 3:
        raise NotImplementedError("only 3x3 kernels supported")
    N, C, H, W = x_nchw.shape
    Wp = W + 2

    # Row stride: smallest >= Wp with H*Sr % 128 == 0 (always lane-dense output).
    Sr = next(s for s in range(Wp, Wp + 129) if (H * s) % 128 == 0)
    Lout = H * Sr
    off0 = (-Sr) % 128                                  # aligns interior pad store
    Lsrc = _round_up(off0 + (H + 2) * Sr + 2, 128)      # covers max tap over-read
    cdt = jnp.dtype(compute_dtype)

    # Row-flat input (no reflect pad here — done in-kernel): zero garbage cols.
    xr = jnp.pad(x_nchw, ((0, 0), (0, 0), (0, 0), (0, Sr - W)))
    xr = xr.reshape(N, C, Lout).astype(cdt)

    # (O, I, kh, kw) -> per-kw folded (C, 3C) matrices: wf[kw][o, kh*C+i] = w[o,i,kh,kw]
    def fold(w):
        return jnp.transpose(w, (3, 0, 2, 1)).reshape(3, C, 3 * C).astype(cdt)
    wf1, wf2 = fold(w1_oihw), fold(w2_oihw)

    # column-within-row index (tiny, resident via constant index_map)
    col = (jnp.arange(Lout, dtype=jnp.int32) % Sr).reshape(1, Lout)

    kernel = _make_kernel(C, H, W, Sr, Lout, off0, cdt)

    cb = cdt.itemsize
    per_image = (2 * C * Lout * cb          # double-buffered input block
                 + 2 * C * Lout * 4         # double-buffered f32 output block
                 + C * Lsrc * cb            # reflect-pad scratch
                 + 4 * 3 * C * (Lout + 2) * cb   # slab + shifted copies
                 + 6 * C * Lout * 4)        # f32 acc / y1 / y2 / res temporaries
    vmem_limit = int(min(64 * 2 ** 20, max(32 * 2 ** 20, 2 * per_image)))

    flops = 2 * N * 2 * 9 * C * C * H * W
    bytes_accessed = int(xr.size * cb + (wf1.size + wf2.size) * cb
                         + col.size * 4 + N * C * Lout * 4)

    out_flat = pl.pallas_call(
        kernel,
        out_shape=jax.ShapeDtypeStruct((N, C, Lout), jnp.float32),
        grid=(N,),
        in_specs=[
            pl.BlockSpec((1, C, Lout), lambda n: (n, 0, 0)),       # row-flat image
            pl.BlockSpec((3, C, 3 * C), lambda n: (0, 0, 0)),      # layer1 folded W
            pl.BlockSpec((3, C, 3 * C), lambda n: (0, 0, 0)),      # layer2 folded W
            pl.BlockSpec((1, Lout), lambda n: (0, 0)),             # col-in-row index
        ],
        out_specs=pl.BlockSpec((1, C, Lout), lambda n: (n, 0, 0)),
        scratch_shapes=[pltpu.VMEM((C, Lsrc), cdt)],               # shared pad scratch
        compiler_params=pltpu.CompilerParams(
            dimension_semantics=("parallel",), vmem_limit_bytes=vmem_limit),
        cost_estimate=pl.CostEstimate(flops=flops, transcendentals=2 * N * C,
                                      bytes_accessed=bytes_accessed),
    )(xr, wf1, wf2, col)

    # (N, C, H*Sr) -> (N, C, H, W): drop the stride-garbage columns.
    return out_flat.reshape(N, C, H, Sr)[..., :W]


# --------------------------- pure-JAX reference ------------------------------

def _reference(x_nchw, w1, w2, k=3):
    p = (k - 1) // 2

    def conv_in(x, w):
        xp = jnp.pad(x, ((0, 0), (0, 0), (p, p), (p, p)), mode="reflect")
        y = jax.lax.conv_general_dilated(
            xp, w, (1, 1), "VALID", dimension_numbers=("NCHW", "OIHW", "NCHW"))
        m = jnp.mean(y, axis=(2, 3), keepdims=True)
        v = jnp.mean((y - m) ** 2, axis=(2, 3), keepdims=True)
        return (y - m) * jax.lax.rsqrt(v + EPS)

    y = jnp.maximum(conv_in(x_nchw, w1), 0.0)
    y = conv_in(y, w2)
    return jnp.maximum(x_nchw + y, 0.0)


# ---------------------------------- main -------------------------------------

if __name__ == "__main__":
    key = jax.random.PRNGKey(0)
    k_x, k_w1, k_w2 = jax.random.split(key, 3)

    # Small validation shapes (dim = C = 4); tune at C >= 128 (see review note).
    N, C, H, W = 2, 4, 16, 16
    x = jax.random.normal(k_x, (N, C, H, W), jnp.float32)
    # kernel_initializer: normal(mean=0, std=0.02), Conv2d weight shape (O, I, 3, 3)
    w1 = 0.02 * jax.random.normal(k_w1, (C, C, 3, 3), jnp.float32)
    w2 = 0.02 * jax.random.normal(k_w2, (C, C, 3, 3), jnp.float32)

    ref = _reference(x, w1, w2)

    # Strict check of the kernel algorithm at full precision.
    out32 = jax.block_until_ready(
        resnet_block_forward(x, w1, w2, compute_dtype=jnp.float32))
    err32 = float(jnp.max(jnp.abs(out32 - ref)))
    if not (out32.shape == (N, C, H, W) and err32 < 1e-4):
        raise SystemExit(f"f32 kernel mismatch vs reference: max_err={err32}")

    # Default production path: bf16 MXU operands, f32 stats — loose sanity gate.
    out16 = jax.block_until_ready(resnet_block_forward(x, w1, w2))
    err16 = float(jnp.max(jnp.abs(out16 - ref)))
    if not (bool(jnp.all(jnp.isfinite(out16))) and err16 < 0.25):
        raise SystemExit(f"bf16 kernel sanity check failed: max_err={err16}")

    print("KERNEL_OK")
</pallas_src>

<mosaic_0001>
module attributes {stable_mosaic.version = 11 : i64} {
  func.func @kernel(%arg0: i32, %arg1: memref<1x4x384xf32, #tpu.memory_space<vmem>>, %arg2: memref<3x4x12xf32, #tpu.memory_space<vmem>>, %arg3: memref<3x4x12xf32, #tpu.memory_space<vmem>>, %arg4: memref<1x384xi32, #tpu.memory_space<vmem>>, %arg5: memref<1x4x384xf32, #tpu.memory_space<vmem>>, %arg6: memref<4x640xf32, #tpu.memory_space<vmem>>) attributes {dimension_semantics = [#tpu.dimension_semantics<parallel>], iteration_bounds = array<i64: 2>, scalar_prefetch = 0 : i64, scratch_operands = 1 : i64, tpu.core_type = #tpu.core_type<tc>, window_params = [{transform_indices = @transform_0, window_bounds = array<i64: 1, 4, 384>}, {pipeline_mode = #tpu.pipeline_mode<synchronous>, transform_indices = @transform_1, window_bounds = array<i64: 3, 4, 12>}, {pipeline_mode = #tpu.pipeline_mode<synchronous>, transform_indices = @transform_2, window_bounds = array<i64: 3, 4, 12>}, {pipeline_mode = #tpu.pipeline_mode<synchronous>, transform_indices = @transform_3, window_bounds = array<i64: 1, 384>}, {transform_indices = @transform_4, window_bounds = array<i64: 1, 4, 384>}]} {
    %c0 = arith.constant 0 : index
    %c0_0 = arith.constant 0 : index
    %0 = vector.load %arg4[%c0, %c0_0] : memref<1x384xi32, #tpu.memory_space<vmem>>, vector<1x384xi32>
    %c16_i32 = arith.constant 16 : i32
    %1 = vector.broadcast %c16_i32 : i32 to vector<1x384xi32>
    %2 = arith.cmpi slt, %0, %1 : vector<1x384xi32>
    %c0_i32 = arith.constant 0 : i32
    %3 = vector.broadcast %c0_i32 : i32 to vector<1x384xi32>
    %4 = arith.cmpi eq, %0, %3 : vector<1x384xi32>
    %c17_i32 = arith.constant 17 : i32
    %5 = vector.broadcast %c17_i32 : i32 to vector<1x384xi32>
    %6 = arith.cmpi eq, %0, %5 : vector<1x384xi32>
    %c0_1 = arith.constant 0 : index
    %c0_2 = arith.constant 0 : index
    %c0_3 = arith.constant 0 : index
    %7 = vector.load %arg1[%c0_1, %c0_2, %c0_3] : memref<1x4x384xf32, #tpu.memory_space<vmem>>, vector<1x4x384xf32>
    %8 = vector.shape_cast %7 : vector<1x4x384xf32> to vector<4x384xf32>
    %9 = vector.extract_strided_slice %8 {offsets = [0, 383], sizes = [4, 1], strides = [1, 1]} : vector<4x384xf32> to vector<4x1xf32>
    %10 = vector.extract_strided_slice %8 {offsets = [0, 0], sizes = [4, 383], strides = [1, 1]} : vector<4x384xf32> to vector<4x383xf32>
    %11 = tpu.concatenate %9, %10 in 1 : vector<4x1xf32>, vector<4x383xf32> -> vector<4x384xf32>
    %12 = vector.extract_strided_slice %8 {offsets = [0, 1], sizes = [4, 383], strides = [1, 1]} : vector<4x384xf32> to vector<4x383xf32>
    %13 = vector.extract_strided_slice %8 {offsets = [0, 0], sizes = [4, 1], strides = [1, 1]} : vector<4x384xf32> to vector<4x1xf32>
    %14 = tpu.concatenate %12, %13 in 1 : vector<4x383xf32>, vector<4x1xf32> -> vector<4x384xf32>
    %15 = vector.extract_strided_slice %8 {offsets = [0, 381], sizes = [4, 3], strides = [1, 1]} : vector<4x384xf32> to vector<4x3xf32>
    %16 = vector.extract_strided_slice %8 {offsets = [0, 0], sizes = [4, 381], strides = [1, 1]} : vector<4x384xf32> to vector<4x381xf32>
    %17 = tpu.concatenate %15, %16 in 1 : vector<4x3xf32>, vector<4x381xf32> -> vector<4x384xf32>
    %18 = vector.shape_cast %6 : vector<1x384xi1> to vector<1x384xi1>
    %19 = vector.broadcast %18 : vector<1x384xi1> to vector<4x384xi1>
    %20 = arith.select %19, %17, %11 : vector<4x384xi1>, vector<4x384xf32>
    %21 = vector.shape_cast %4 : vector<1x384xi1> to vector<1x384xi1>
    %22 = vector.broadcast %21 : vector<1x384xi1> to vector<4x384xi1>
    %23 = arith.select %22, %14, %20 : vector<4x384xi1>, vector<4x384xf32>
    %c0_4 = arith.constant 0 : index
    %c128 = arith.constant 128 : index
    %24 = vector.load %arg6[%c0_4, %c128] : memref<4x640xf32, #tpu.memory_space<vmem>>, vector<4x384xf32>
    tpu.vector_store %arg6[%c0_4, %c128], %23 {strides = array<i32>} : memref<4x640xf32, #tpu.memory_space<vmem>>, vector<4x384xf32>,
    %25 = vector.extract_strided_slice %23 {offsets = [0, 24], sizes = [4, 24], strides = [1, 1]} : vector<4x384xf32> to vector<4x24xf32>
    %c0_5 = arith.constant 0 : index
    %c104 = arith.constant 104 : index
    %26 = vector.load %arg6[%c0_5, %c104] : memref<4x640xf32, #tpu.memory_space<vmem>>, vector<4x24xf32>
    tpu.vector_store %arg6[%c0_5, %c104], %25 {strides = array<i32>} : memref<4x640xf32, #tpu.memory_space<vmem>>, vector<4x24xf32>,
    %27 = vector.extract_strided_slice %23 {offsets = [0, 336], sizes = [4, 24], strides = [1, 1]} : vector<4x384xf32> to vector<4x24xf32>
    %c0_6 = arith.constant 0 : index
    %c512 = arith.constant 512 : index
    %28 = vector.load %arg6[%c0_6, %c512] : memref<4x640xf32, #tpu.memory_space<vmem>>, vector<4x24xf32>
    tpu.vector_store %arg6[%c0_6, %c512], %27 {strides = array<i32>} : memref<4x640xf32, #tpu.memory_space<vmem>>, vector<4x24xf32>,
    %c0_7 = arith.constant 0 : index
    %c104_8 = arith.constant 104 : index
    %29 = vector.load %arg6[%c0_7, %c104_8] : memref<4x640xf32, #tpu.memory_space<vmem>>, vector<4x386xf32>
    %c0_9 = arith.constant 0 : index
    %c128_10 = arith.constant 128 : index
    %30 = vector.load %arg6[%c0_9, %c128_10] : memref<4x640xf32, #tpu.memory_space<vmem>>, vector<4x386xf32>
    %c0_11 = arith.constant 0 : index
    %c152 = arith.constant 152 : index
    %31 = vector.load %arg6[%c0_11, %c152] : memref<4x640xf32, #tpu.memory_space<vmem>>, vector<4x386xf32>
    %32 = tpu.concatenate %29, %30, %31 in 0 : vector<4x386xf32>, vector<4x386xf32>, vector<4x386xf32> -> vector<12x386xf32>
    %33 = vector.extract_strided_slice %32 {offsets = [0, 0], sizes = [12, 384], strides = [1, 1]} : vector<12x386xf32> to vector<12x384xf32>
    %34 = vector.extract_strided_slice %32 {offsets = [0, 1], sizes = [12, 384], strides = [1, 1]} : vector<12x386xf32> to vector<12x384xf32>
    %35 = vector.extract_strided_slice %32 {offsets = [0, 2], sizes = [12, 384], strides = [1, 1]} : vector<12x386xf32> to vector<12x384xf32>
    %c0_12 = arith.constant 0 : index
    %c0_13 = arith.constant 0 : index
    %c0_14 = arith.constant 0 : index
    %36 = vector.load %arg2[%c0_12, %c0_13, %c0_14] : memref<3x4x12xf32, #tpu.memory_space<vmem>>, vector<1x4x12xf32>
    %37 = vector.shape_cast %36 : vector<1x4x12xf32> to vector<4x12xf32>
    %cst = arith.constant dense<0.000000e+00> : vector<4x384xf32>
    %38 = tpu.matmul %37, %33, %cst {dimension_numbers = #tpu.dot_dimension_numbers<[1], [0], [0], [1], [0, 0, 1, 1], [], []>} : vector<4x12xf32>, vector<12x384xf32>, vector<4x384xf32> -> vector<4x384xf32>
    %c1 = arith.constant 1 : index
    %c0_15 = arith.constant 0 : index
    %c0_16 = arith.constant 0 : index
    %39 = vector.load %arg2[%c1, %c0_15, %c0_16] : memref<3x4x12xf32, #tpu.memory_space<vmem>>, vector<1x4x12xf32>
    %40 = vector.shape_cast %39 : vector<1x4x12xf32> to vector<4x12xf32>
    %cst_17 = arith.constant dense<0.000000e+00> : vector<4x384xf32>
    %41 = tpu.matmul %40, %34, %cst_17 {dimension_numbers = #tpu.dot_dimension_numbers<[1], [0], [0], [1], [0, 0, 1, 1], [], []>} : vector<4x12xf32>, vector<12x384xf32>, vector<4x384xf32> -> vector<4x384xf32>
    %42 = arith.addf %38, %41 : vector<4x384xf32>
    %c2 = arith.constant 2 : index
    %c0_18 = arith.constant 0 : index
    %c0_19 = arith.constant 0 : index
    %43 = vector.load %arg2[%c2, %c0_18, %c0_19] : memref<3x4x12xf32, #tpu.memory_space<vmem>>, vector<1x4x12xf32>
    %44 = vector.shape_cast %43 : vector<1x4x12xf32> to vector<4x12xf32>
    %cst_20 = arith.constant dense<0.000000e+00> : vector<4x384xf32>
    %45 = tpu.matmul %44, %35, %cst_20 {dimension_numbers = #tpu.dot_dimension_numbers<[1], [0], [0], [1], [0, 0, 1, 1], [], []>} : vector<4x12xf32>, vector<12x384xf32>, vector<4x384xf32> -> vector<4x384xf32>
    %46 = arith.addf %42, %45 : vector<4x384xf32>
    %47 = vector.extract_strided_slice %34 {offsets = [4, 0], sizes = [4, 384], strides = [1, 1]} : vector<12x384xf32> to vector<4x384xf32>
    %cst_21 = arith.constant 0.000000e+00 : f32
    %48 = vector.shape_cast %2 : vector<1x384xi1> to vector<1x384xi1>
    %49 = vector.broadcast %48 : vector<1x384xi1> to vector<4x384xi1>
    %50 = vector.broadcast %cst_21 : f32 to vector<4x384xf32>
    %51 = arith.select %49, %46, %50 : vector<4x384xi1>, vector<4x384xf32>
    %cst_22 = arith.constant dense<0.000000e+00> : vector<4xf32>
    %52 = vector.multi_reduction <add>, %51, %cst_22 [1] : vector<4x384xf32> to vector<4xf32>
    %53 = vector.shape_cast %52 : vector<4xf32> to vector<4x1xf32>
    %cst_23 = arith.constant 3.906250e-03 : f32
    %54 = vector.broadcast %cst_23 : f32 to vector<4x1xf32>
    %55 = arith.mulf %53, %54 : vector<4x1xf32>
    %56 = vector.broadcast %55 : vector<4x1xf32> to vector<4x384xf32>
    %57 = arith.subf %46, %56 : vector<4x384xf32>
    %cst_24 = arith.constant 0.000000e+00 : f32
    %58 = vector.shape_cast %2 : vector<1x384xi1> to vector<1x384xi1>
    %59 = vector.broadcast %58 : vector<1x384xi1> to vector<4x384xi1>
    %60 = vector.broadcast %cst_24 : f32 to vector<4x384xf32>
    %61 = arith.select %59, %57, %60 : vector<4x384xi1>, vector<4x384xf32>
    %62 = arith.mulf %61, %61 : vector<4x384xf32>
    %cst_25 = arith.constant dense<0.000000e+00> : vector<4xf32>
    %63 = vector.multi_reduction <add>, %62, %cst_25 [1] : vector<4x384xf32> to vector<4xf32>
    %64 = vector.shape_cast %63 : vector<4xf32> to vector<4x1xf32>
    %cst_26 = arith.constant 3.906250e-03 : f32
    %65 = vector.broadcast %cst_26 : f32 to vector<4x1xf32>
    %66 = arith.mulf %64, %65 : vector<4x1xf32>
    %67 = vector.broadcast %55 : vector<4x1xf32> to vector<4x384xf32>
    %68 = arith.subf %46, %67 : vector<4x384xf32>
    %cst_27 = arith.constant 9.99999974E-6 : f32
    %69 = vector.broadcast %cst_27 : f32 to vector<4x1xf32>
    %70 = arith.addf %66, %69 : vector<4x1xf32>
    %71 = math.rsqrt %70 : vector<4x1xf32>
    %72 = vector.broadcast %71 : vector<4x1xf32> to vector<4x384xf32>
    %73 = arith.mulf %68, %72 : vector<4x384xf32>
    %cst_28 = arith.constant 0.000000e+00 : f32
    %74 = vector.broadcast %cst_28 : f32 to vector<4x384xf32>
    %75 = arith.maximumf %73, %74 : vector<4x384xf32>
    %76 = vector.extract_strided_slice %75 {offsets = [0, 383], sizes = [4, 1], strides = [1, 1]} : vector<4x384xf32> to vector<4x1xf32>
    %77 = vector.extract_strided_slice %75 {offsets = [0, 0], sizes = [4, 383], strides = [1, 1]} : vector<4x384xf32> to vector<4x383xf32>
    %78 = tpu.concatenate %76, %77 in 1 : vector<4x1xf32>, vector<4x383xf32> -> vector<4x384xf32>
    %79 = vector.extract_strided_slice %75 {offsets = [0, 1], sizes = [4, 383], strides = [1, 1]} : vector<4x384xf32> to vector<4x383xf32>
    %80 = vector.extract_strided_slice %75 {offsets = [0, 0], sizes = [4, 1], strides = [1, 1]} : vector<4x384xf32> to vector<4x1xf32>
    %81 = tpu.concatenate %79, %80 in 1 : vector<4x383xf32>, vector<4x1xf32> -> vector<4x384xf32>
    %82 = vector.extract_strided_slice %75 {offsets = [0, 381], sizes = [4, 3], strides = [1, 1]} : vector<4x384xf32> to vector<4x3xf32>
    %83 = vector.extract_strided_slice %75 {offsets = [0, 0], sizes = [4, 381], strides = [1, 1]} : vector<4x384xf32> to vector<4x381xf32>
    %84 = tpu.concatenate %82, %83 in 1 : vector<4x3xf32>, vector<4x381xf32> -> vector<4x384xf32>
    %85 = vector.shape_cast %6 : vector<1x384xi1> to vector<1x384xi1>
    %86 = vector.broadcast %85 : vector<1x384xi1> to vector<4x384xi1>
    %87 = arith.select %86, %84, %78 : vector<4x384xi1>, vector<4x384xf32>
    %88 = vector.shape_cast %4 : vector<1x384xi1> to vector<1x384xi1>
    %89 = vector.broadcast %88 : vector<1x384xi1> to vector<4x384xi1>
    %90 = arith.select %89, %81, %87 : vector<4x384xi1>, vector<4x384xf32>
    %c0_29 = arith.constant 0 : index
    %c128_30 = arith.constant 128 : index
    %91 = vector.load %arg6[%c0_29, %c128_30] : memref<4x640xf32, #tpu.memory_space<vmem>>, vector<4x384xf32>
    tpu.vector_store %arg6[%c0_29, %c128_30], %90 {strides = array<i32>} : memref<4x640xf32, #tpu.memory_space<vmem>>, vector<4x384xf32>,
    %92 = vector.extract_strided_slice %90 {offsets = [0, 24], sizes = [4, 24], strides = [1, 1]} : vector<4x384xf32> to vector<4x24xf32>
    %c0_31 = arith.constant 0 : index
    %c104_32 = arith.constant 104 : index
    %93 = vector.load %arg6[%c0_31, %c104_32] : memref<4x640xf32, #tpu.memory_space<vmem>>, vector<4x24xf32>
    tpu.vector_store %arg6[%c0_31, %c104_32], %92 {strides = array<i32>} : memref<4x640xf32, #tpu.memory_space<vmem>>, vector<4x24xf32>,
    %94 = vector.extract_strided_slice %90 {offsets = [0, 336], sizes = [4, 24], strides = [1, 1]} : vector<4x384xf32> to vector<4x24xf32>
    %c0_33 = arith.constant 0 : index
    %c512_34 = arith.constant 512 : index
    %95 = vector.load %arg6[%c0_33, %c512_34] : memref<4x640xf32, #tpu.memory_space<vmem>>, vector<4x24xf32>
    tpu.vector_store %arg6[%c0_33, %c512_34], %94 {strides = array<i32>} : memref<4x640xf32, #tpu.memory_space<vmem>>, vector<4x24xf32>,
    %c0_35 = arith.constant 0 : index
    %c104_36 = arith.constant 104 : index
    %96 = vector.load %arg6[%c0_35, %c104_36] : memref<4x640xf32, #tpu.memory_space<vmem>>, vector<4x386xf32>
    %c0_37 = arith.constant 0 : index
    %c128_38 = arith.constant 128 : index
    %97 = vector.load %arg6[%c0_37, %c128_38] : memref<4x640xf32, #tpu.memory_space<vmem>>, vector<4x386xf32>
    %c0_39 = arith.constant 0 : index
    %c152_40 = arith.constant 152 : index
    %98 = vector.load %arg6[%c0_39, %c152_40] : memref<4x640xf32, #tpu.memory_space<vmem>>, vector<4x386xf32>
    %99 = tpu.concatenate %96, %97, %98 in 0 : vector<4x386xf32>, vector<4x386xf32>, vector<4x386xf32> -> vector<12x386xf32>
    %100 = vector.extract_strided_slice %99 {offsets = [0, 0], sizes = [12, 384], strides = [1, 1]} : vector<12x386xf32> to vector<12x384xf32>
    %101 = vector.extract_strided_slice %99 {offsets = [0, 1], sizes = [12, 384], strides = [1, 1]} : vector<12x386xf32> to vector<12x384xf32>
    %102 = vector.extract_strided_slice %99 {offsets = [0, 2], sizes = [12, 384], strides = [1, 1]} : vector<12x386xf32> to vector<12x384xf32>
    %c0_41 = arith.constant 0 : index
    %c0_42 = arith.constant 0 : index
    %c0_43 = arith.constant 0 : index
    %103 = vector.load %arg3[%c0_41, %c0_42, %c0_43] : memref<3x4x12xf32, #tpu.memory_space<vmem>>, vector<1x4x12xf32>
    %104 = vector.shape_cast %103 : vector<1x4x12xf32> to vector<4x12xf32>
    %cst_44 = arith.constant dense<0.000000e+00> : vector<4x384xf32>
    %105 = tpu.matmul %104, %100, %cst_44 {dimension_numbers = #tpu.dot_dimension_numbers<[1], [0], [0], [1], [0, 0, 1, 1], [], []>} : vector<4x12xf32>, vector<12x384xf32>, vector<4x384xf32> -> vector<4x384xf32>
    %c1_45 = arith.constant 1 : index
    %c0_46 = arith.constant 0 : index
    %c0_47 = arith.constant 0 : index
    %106 = vector.load %arg3[%c1_45, %c0_46, %c0_47] : memref<3x4x12xf32, #tpu.memory_space<vmem>>, vector<1x4x12xf32>
    %107 = vector.shape_cast %106 : vector<1x4x12xf32> to vector<4x12xf32>
    %cst_48 = arith.constant dense<0.000000e+00> : vector<4x384xf32>
    %108 = tpu.matmul %107, %101, %cst_48 {dimension_numbers = #tpu.dot_dimension_numbers<[1], [0], [0], [1], [0, 0, 1, 1], [], []>} : vector<4x12xf32>, vector<12x384xf32>, vector<4x384xf32> -> vector<4x384xf32>
    %109 = arith.addf %105, %108 : vector<4x384xf32>
    %c2_49 = arith.constant 2 : index
    %c0_50 = arith.constant 0 : index
    %c0_51 = arith.constant 0 : index
    %110 = vector.load %arg3[%c2_49, %c0_50, %c0_51] : memref<3x4x12xf32, #tpu.memory_space<vmem>>, vector<1x4x12xf32>
    %111 = vector.shape_cast %110 : vector<1x4x12xf32> to vector<4x12xf32>
    %cst_52 = arith.constant dense<0.000000e+00> : vector<4x384xf32>
    %112 = tpu.matmul %111, %102, %cst_52 {dimension_numbers = #tpu.dot_dimension_numbers<[1], [0], [0], [1], [0, 0, 1, 1], [], []>} : vector<4x12xf32>, vector<12x384xf32>, vector<4x384xf32> -> vector<4x384xf32>
    %113 = arith.addf %109, %112 : vector<4x384xf32>
    %cst_53 = arith.constant 0.000000e+00 : f32
    %114 = vector.shape_cast %2 : vector<1x384xi1> to vector<1x384xi1>
    %115 = vector.broadcast %114 : vector<1x384xi1> to vector<4x384xi1>
    %116 = vector.broadcast %cst_53 : f32 to vector<4x384xf32>
    %117 = arith.select %115, %113, %116 : vector<4x384xi1>, vector<4x384xf32>
    %cst_54 = arith.constant dense<0.000000e+00> : vector<4xf32>
    %118 = vector.multi_reduction <add>, %117, %cst_54 [1] : vector<4x384xf32> to vector<4xf32>
    %119 = vector.shape_cast %118 : vector<4xf32> to vector<4x1xf32>
    %cst_55 = arith.constant 3.906250e-03 : f32
    %120 = vector.broadcast %cst_55 : f32 to vector<4x1xf32>
    %121 = arith.mulf %119, %120 : vector<4x1xf32>
    %122 = vector.broadcast %121 : vector<4x1xf32> to vector<4x384xf32>
    %123 = arith.subf %113, %122 : vector<4x384xf32>
    %cst_56 = arith.constant 0.000000e+00 : f32
    %124 = vector.shape_cast %2 : vector<1x384xi1> to vector<1x384xi1>
    %125 = vector.broadcast %124 : vector<1x384xi1> to vector<4x384xi1>
    %126 = vector.broadcast %cst_56 : f32 to vector<4x384xf32>
    %127 = arith.select %125, %123, %126 : vector<4x384xi1>, vector<4x384xf32>
    %128 = arith.mulf %127, %127 : vector<4x384xf32>
    %cst_57 = arith.constant dense<0.000000e+00> : vector<4xf32>
    %129 = vector.multi_reduction <add>, %128, %cst_57 [1] : vector<4x384xf32> to vector<4xf32>
    %130 = vector.shape_cast %129 : vector<4xf32> to vector<4x1xf32>
    %cst_58 = arith.constant 3.906250e-03 : f32
    %131 = vector.broadcast %cst_58 : f32 to vector<4x1xf32>
    %132 = arith.mulf %130, %131 : vector<4x1xf32>
    %133 = vector.broadcast %121 : vector<4x1xf32> to vector<4x384xf32>
    %134 = arith.subf %113, %133 : vector<4x384xf32>
    %cst_59 = arith.constant 9.99999974E-6 : f32
    %135 = vector.broadcast %cst_59 : f32 to vector<4x1xf32>
    %136 = arith.addf %132, %135 : vector<4x1xf32>
    %137 = math.rsqrt %136 : vector<4x1xf32>
    %138 = vector.broadcast %137 : vector<4x1xf32> to vector<4x384xf32>
    %139 = arith.mulf %134, %138 : vector<4x384xf32>
    %140 = arith.addf %47, %139 : vector<4x384xf32>
    %cst_60 = arith.constant 0.000000e+00 : f32
    %141 = vector.broadcast %cst_60 : f32 to vector<4x384xf32>
    %142 = arith.maximumf %140, %141 : vector<4x384xf32>
    %c0_61 = arith.constant 0 : index
    %c0_62 = arith.constant 0 : index
    %c0_63 = arith.constant 0 : index
    %143 = vector.load %arg5[%c0_61, %c0_62, %c0_63] : memref<1x4x384xf32, #tpu.memory_space<vmem>>, vector<1x4x384xf32>
    %144 = vector.shape_cast %143 : vector<1x4x384xf32> to vector<4x384xf32>
    %145 = vector.shape_cast %142 : vector<4x384xf32> to vector<1x4x384xf32>
    tpu.vector_store %arg5[%c0_61, %c0_62, %c0_63], %145 {strides = array<i32>} : memref<1x4x384xf32, #tpu.memory_space<vmem>>, vector<1x4x384xf32>,
    return
  }
  func.func @transform_0(%arg0: i32) -> (i32, i32, i32) {
    %c0_i32 = arith.constant 0 : i32
    %c0_i32_0 = arith.constant 0 : i32
    %c0_i32_1 = arith.constant 0 : i32
    return %arg0, %c0_i32, %c0_i32_0 : i32, i32, i32
  }
  func.func @transform_1(%arg0: i32) -> (i32, i32, i32) {
    %c0_i32 = arith.constant 0 : i32
    %c0_i32_0 = arith.constant 0 : i32
    %c0_i32_1 = arith.constant 0 : i32
    %c0_i32_2 = arith.constant 0 : i32
    return %c0_i32, %c0_i32_0, %c0_i32_1 : i32, i32, i32
  }
  func.func @transform_2(%arg0: i32) -> (i32, i32, i32) {
    %c0_i32 = arith.constant 0 : i32
    %c0_i32_0 = arith.constant 0 : i32
    %c0_i32_1 = arith.constant 0 : i32
    %c0_i32_2 = arith.constant 0 : i32
    return %c0_i32, %c0_i32_0, %c0_i32_1 : i32, i32, i32
  }
  func.func @transform_3(%arg0: i32) -> (i32, i32) {
    %c0_i32 = arith.constant 0 : i32
    %c0_i32_0 = arith.constant 0 : i32
    %c0_i32_1 = arith.constant 0 : i32
    return %c0_i32, %c0_i32_0 : i32, i32
  }
  func.func @transform_4(%arg0: i32) -> (i32, i32, i32) {
    %c0_i32 = arith.constant 0 : i32
    %c0_i32_0 = arith.constant 0 : i32
    %c0_i32_1 = arith.constant 0 : i32
    return %arg0, %c0_i32, %c0_i32_0 : i32, i32, i32
  }
}

</mosaic_0001>

<bundles_post_ra>
// kernel: tpu_custom_call.1
= control target key start
LH: loop header
LB: loop body
LE: loop exit
PB: predicated region body
PF: predicated region fallthrough
CT: control target
= control target key end

     0   :  { %9 = vsyncpa [#allocation4], 0  ;;  %s3032_s0 = inlined_call_operand.hbm [shape: f32[2,4,384], index: 0, kind: input, shape index: {}]   ;;  %s3033_s1 = inlined_call_operand.hbm [shape: f32[3,4,12], index: 1, kind: input, shape index: {}]   ;;  %s3034_s2 = inlined_call_operand.hbm [shape: f32[3,4,12], index: 2, kind: input, shape index: {}]   ;;  %s3035_s3 = inlined_call_operand.vmem [shape: s32[1,384], index: 3, kind: input, shape index: {}]   ;;  %s3036_s4 = inlined_call_operand.hbm [shape: f32[2,4,384], index: 4, kind: output, shape index: {}]  }
   0x1   :  { %11 = vsyncpa [#allocation4 + $0x1], 0 }
   0x2   :  { %12 = vsyncpa [#allocation7], 0 }
   0x3   :  { %13 = vsyncpa [#allocation5], 0 }
   0x4   :  { %15 = vsyncpa [#allocation5 + $0x1], 0  ;;  %s2442_s15 = smov 0   ;;  %s2444_s16 = smov 0  }
   0x5   :  { %s2446_s17 = smov 0   ;;  %s2448_s18 = smov 0  }
   0x6 LB: > { %s2463_s19 = sadd.s32 4294967295, %s2394_s18   ;;  %s1820_s20 = sadd.s32 4294967294, %s2394_s18   ;;  %s2394_s18 = sphi %s2448_s18, %s3111_s18   ;;  %s2390_s17 = sphi %s2446_s17, %s3110_s17   ;;  %s2386_s16 = sphi %s2444_s16, %s3109_s16   ;;  %s2382_s15 = sphi %s2442_s15, %s3108_s15  }
   0x7   : > { %p41_p0 = scmp.ne.s32.totalorder %s2386_s16, %s2382_s15  ;;  %p3037_p1 = scmp.eq.s32.totalorder %s2463_s19, 0 }
   0x8   : > { %p134_p3 = scmp.eq.s32.totalorder %s1820_s20, 1  ;;  %p1821_p5 = scmp.ge.s32.totalorder %s2394_s18, 1 }
   0x9   : > { %p2472_p4 = por %p3037_p1, %p41_p0  ;;  %p141_p7 = scmp.lt.s32.totalorder %s2394_s18, 3 }
   0xa   : > { %p2477_p6 = por %p134_p3, %p41_p0  ;;  %s2396_s24 = smov [#allocation6]  }
   0xb   : > { %s3047_s21 = scalar_select %p2472_p4, 1, 0 }
   0xc   : > { %s3048_s22 = scalar_select %p2477_p6, 1, 0 }
   0xd   : > { %p2482_p8 = pnand %p1821_p5, %p141_p7  ;;  %s153_s25 = sshll.u32 %s2396_s24, 4  ;;  %s2486_s25 = int_to_ptr.vmem [resolvable:$true] %s153_s25 }
   0xe   : > { %s2397_s27 = smov [#allocation8]   ;;  %s2238_s5 = scalar_lea.hbm %s3033_s1, 192 }
   0xf   : > { %p2014_p9 = pneg %p2482_p8  ;;  %s166_s28 = sshll.u32 %s2397_s27, 4  ;;  %s2497_s28 = int_to_ptr.vmem [resolvable:$true] %s166_s28 }
  0x10   : > { %p2239_p12 = scmp.ne.s32.totalorder %s3033_s1, %s2238_s5  ;;  %p2245_p5 = scmp.lt.u32.totalorder %s2238_s5, %s3033_s1 }
  0x11   : > { %p2493_p11 = pnand %p2014_p9, %p3037_p1 }
  0x13   : > { %p2240_p13 = pneg %p2493_p11 }
  0x15   : > { %p2241_p0 = pnand %p2240_p13, %p2239_p12 }
  0x17   : > { %p2242_p3 = pneg %p2241_p0 }
  0x19   : > { %p2247_p7 = pnand %p2245_p5, %p2242_p3 }
  0x1b   : > { %2250 = shalt.err (!%p2247_p7)
}
  0x1c   : > { %s2251_s10 = scalar_lea.vmem %s2486_s25, 192  ;;  %p2259_p2 = scmp.lt.s32.totalorder %s2486_s25, %s2486_s25 }
  0x1d   : > { %p2252_p9 = scmp.ne.s32.totalorder %s2486_s25, %s2251_s10  ;;  %p2260_p12 = scmp.lt.s32.totalorder %s2251_s10, %s2251_s10 }
  0x1f   : > { %p2254_p10 = pnand %p2252_p9, %p2240_p13  ;;  %p2261_p0 = por %p2260_p12, %p2259_p2 }
  0x21   : > { %p2255_p1 = pneg %p2254_p10 }
  0x23   : > { %p2262_p6 = pnand %p2261_p0, %p2255_p1 }
  0x25   : > { %2265 = shalt.err (!%p2262_p6)
}
  0x26   : > { %s2398_s11 = smov 64   ;;  %s2399_s12 = smov 4  }
  0x27   : > { %2017 = dma.hbm_to_vmem [thread:$0]  (!%p2493_p11), %s3033_s1, 192, %s2486_s25, [#allocation7], %s2398_s11, %s2398_s11, %s2399_s12  }
  0x28   : > { %s2266_s27 = scalar_lea.hbm %s3034_s2, 192 }
  0x29   : > { %p2267_p2 = scmp.ne.s32.totalorder %s3034_s2, %s2266_s27  ;;  %p2273_p10 = scmp.lt.u32.totalorder %s2266_s27, %s3034_s2 }
  0x2b   : > { %p2269_p1 = pnand %p2267_p2, %p2240_p13 }
  0x2d   : > { %p2270_p6 = pneg %p2269_p1 }
  0x2f   : > { %p2275_p3 = pnand %p2273_p10, %p2270_p6 }
  0x31   : > { %2278 = shalt.err (!%p2275_p3)
}
  0x32   : > { %s2279_s25 = scalar_lea.vmem %s2497_s28, 192  ;;  %p2287_p12 = scmp.lt.s32.totalorder %s2497_s28, %s2497_s28 }
  0x33   : > { %p2280_p5 = scmp.ne.s32.totalorder %s2497_s28, %s2279_s25  ;;  %p2288_p0 = scmp.lt.s32.totalorder %s2279_s25, %s2279_s25 }
  0x35   : > { %p2282_p7 = pnand %p2280_p5, %p2240_p13  ;;  %p2289_p2 = por %p2288_p0, %p2287_p12 }
  0x37   : > { %p2283_p9 = pneg %p2282_p7 }
  0x39   : > { %p2290_p1 = pnand %p2289_p2, %p2283_p9 }
  0x3b   : > { %2293 = shalt.err (!%p2290_p1)
}
  0x3c   : > { %2020 = dma.hbm_to_vmem [thread:$0]  (!%p2493_p11), %s3034_s2, 192, %s2497_s28, [#allocation7], %s2398_s11, %s2398_s11, %s2399_s12  }
  0x3d   : > { %s2552_s9 = sadd.s32 1, %s2394_s18   ;;  %s28_s26 = sadd.s32 1, %s2390_s17 }
  0x3e   : > { %s25_s10 = ssub.s32 %s2394_s18, %s2552_s9  ;;  %p35_p13 = scmp.ne.s32.totalorder %s2390_s17, %s2386_s16 }
  0x3f   : > { %p26_p6 = scmp.eq.s32.totalorder %s25_s10, 0  ;;  %p36_p10 = scmp.eq.s32.totalorder %s2394_s18, 0 }
  0x40   : > { %p3051_p3 = scmp.eq.s32.totalorder %s2463_s19, 1  ;;  %p2031_p7 = scmp.lt.s32.totalorder %s2394_s18, 2 }
  0x41   : > { %s2568_s14 = scalar_select %p26_p6, %s2390_s17, %s28_s26  }
  0x42   : > { %p2562_p5 = por %p3051_p3, %p35_p13  ;;  %p37_p9 = por %p36_p10, %p35_p13 }
  0x43   : > { %s183_s20 = sand.u32 1, %s2390_s17   ;;  %s1999_s28 = smul.u32 192, %s2394_s18 }
  0x44   : > { %s3052_s13 = scalar_select %p2562_p5, 1, 0 }
  0x45   : > { %s1998_s24 = smul.u32 12, %s183_s20  ;;  %p2572_p11 = pnand %p2031_p7, %p37_p9 }
  0x46   : > { %s2579_s29 = scalar_lea.hbm %s3032_s0, %s1999_s28  ;;  %s184_s6 = scalar_lea.sflag [#allocation4], %s183_s20 }
  0x47   : > { %s187_s30 = scalar_lea.vmem [#allocation3], %s1998_s24  ;;  %s2294_s25 = scalar_lea.hbm %s2579_s29, 192 }
  0x48   : > { %s195_s5 = sshll.u32 %s187_s30, 4  ;;  %p2295_p12 = scmp.ne.s32.totalorder %s2579_s29, %s2294_s25  ;;  %s2581_s5 = int_to_ptr.vmem [resolvable:$true] %s195_s5 }
  0x49   : > { %p2296_p0 = pneg %p2572_p11  ;;  %s2299_s26 = scalar_lea.hbm %s3032_s0, 384 }
  0x4a   : > { %p2300_p13 = scmp.lt.u32.totalorder %s2579_s29, %s3032_s0  ;;  %p2301_p6 = scmp.lt.u32.totalorder %s2299_s26, %s2294_s25 }
  0x4b   : > { %p2297_p2 = pnand %p2296_p0, %p2295_p12  ;;  %p2303_p3 = scmp.lt.u32.totalorder %s2294_s25, %s2579_s29 }
  0x4c   : > { %p2302_p10 = por %p2301_p6, %p2300_p13 }
  0x4d   : > { %p2298_p1 = pneg %p2297_p2 }
  0x4e   : > { %p2304_p7 = por %p2303_p3, %p2302_p10 }
  0x50   : > { %p2305_p9 = pnand %p2304_p7, %p2298_p1 }
  0x52   : > { %2308 = shalt.err (!%p2305_p9)
}
  0x53   : > { %s2309_s20 = scalar_lea.vmem %s2581_s5, 192  ;;  %s2400_s24 = smov [#allocation3]  }
  0x54   : > { %p2310_p12 = scmp.ne.s32.totalorder %s2581_s5, %s2309_s20  ;;  %s2314_s12 = sshll.u32 %s2400_s24, 4  ;;  %s2315_s12 = int_to_ptr.vmem [resolvable:$false] %s2314_s12 }
  0x55   : > { %s2316_s27 = scalar_lea.vmem %s2315_s12, 384  ;;  %p2317_p4 = scmp.lt.s32.totalorder %s2581_s5, %s2315_s12 }
  0x56   : > { %p2312_p2 = pnand %p2310_p12, %p2296_p0  ;;  %p2318_p13 = scmp.lt.s32.totalorder %s2316_s27, %s2309_s20 }
  0x58   : > { %p2313_p5 = pneg %p2312_p2  ;;  %p2319_p6 = por %p2318_p13, %p2317_p4 }
  0x5a   : > { %p2320_p10 = pnand %p2319_p6, %p2313_p5 }
  0x5c   : > { %2323 = shalt.err (!%p2320_p10)
}
  0x5d   : > { %2024 = dma.hbm_to_vmem [thread:$0]  (!%p2572_p11), %s2579_s29, 192, %s2581_s5, %s184_s6  }
  0x5e   : > { %204 = sbr.rel (%p2482_p8) target bundleno = 2457 (0x999), region = 36  ;;  %s2611_s30 = sand.u32 (!%p2482_p8), 1, %s2386_s16  }
  0x5f   : > { %s2000_s25 = smul.u32 (!%p2482_p8), 12, %s2611_s30  ;;  %s207_s7 = scalar_lea.sflag (!%p2482_p8), [#allocation4], %s2611_s30 }
  0x60   : > { %p3054_p4 = scmp.ne.s32.totalorder (!%p2482_p8), %s3047_s21, 0 }
  0x61   : > { %s210_s8 = scalar_lea.vmem (!%p2482_p8), [#allocation3], %s2000_s25 }
  0x65   : > { %2369 = dma.done.wait (%p3054_p4), %s207_s7, 192  }
  0x66   : > { %2371 = vsyncadd (%p3054_p4), %s207_s7, 4294967104  ;;  %p3055_p5 = scmp.eq.s32.totalorder %s2463_s19, 0 }
  0x68   : > { %2373 = dma.done.wait (%p3055_p5), [#allocation7], 384   ;;  %p3056_p8 = pmov %p3055_p5 }
  0x69   : > { %v248_v0 = vld [vmem:[%s210_s8 + $0x8] sm:$0xf]  ;;  %v247_v1 = vld [vmem:[%s210_s8] sm:$0xff]  ;;  %s2401_s23 = smov 3   ;;  %s2402_s11 = smov 1   ;;  %v295_v3 = vlaneseq  ;;  %v2404_v7 = vmov 0  }
  0x6a   : > { %2375 = vsyncadd (%p3056_p8), [#allocation7], 4294966912  ;;  %280 = vrot.lane.b32.xlu1 %v248_v0, %s2401_s23  ;;  %250 = vrot.lane.b32.xlu0 %v248_v0, %s2402_s11  ;;  %v254_v2 = vcombine.high %v247_v1, %v247_v1  ;;  %s2403_s21 = smov 127   ;;  %v2637_v4 = vld [vmem:[%s3035_s3] sm:$0x7]  ;;  %vm287_vm2 = vcmask 23552  }
  0x6b   : > { %v296_v5 = vshrl.u32 %v295_v3, 7  ;;  %vm246_vm0 = vcmp.eq.s32.totalorder %v2637_v4, 17  ;;  %vm245_vm1 = vcmp.eq.s32.totalorder %v2637_v4, 0  ;;  %vm259_vm3 = vcmask 7168   ;;  %s2405_s6 = smov 48   ;;  %s2406_s26 = smov 80  }
  0x6c   : > { %v294_v8 = vsel %vm246_vm0, 1, %v2404_v7  ;;  %v313_v11 = vsel %vm245_vm1, 1, %v2404_v7  ;;  %vm272_vm4 = vcmask 1039360   ;;  %s2407_s10 = smov 104   ;;  %vm3046_vm11 = vcmask 191488   ;;  %s2410_s28 = smov 23  }
  0x6d   : > { %v2641_v6 = vsub.s32 2, %v296_v5  ;;  %v2647_v16 = vsub.s32 1, %v296_v5  ;;  %v2649_v17 = vsub.s32 0, %v296_v5  ;;  %vm3042_vm12 = vcmask 1044288   ;;  %s2412_s20 = smov 24   ;;  %s2413_s24 = smov 22  }
  0x6e   : > { %285 = vrot.lane.b32.xlu1 %v254_v2, %s2401_s23  ;;  %257 = vrot.lane.b32.xlu0 %v254_v2, %s2402_s11  ;;  %vm3041_vm13 = vcmask 850944   ;;  %vm393_vm14 = vcmask 1043456   ;;  %vm3040_vm15 = vcmask 654336   ;;  %vm2411_vm0 = vmmov 0   ;;  %s2415_s12 = smov 105   ;;  %s2001_s27 = smul.u32 192, %s2463_s19 }
  0x6f   : > { %v306_v12 = vrot.slane %v294_v8, %v2641_v6  ;;  %v325_v13 = vrot.slane %v313_v11, %v2641_v6  ;;  %v302_v26 = vrot.slane %v294_v8, %v2647_v16  ;;  %v298_v27 = vrot.slane %v294_v8, %v2649_v17  ;;  %s242_s7 = scalar_lea.vmem [#allocation9], %s2000_s25  ;;  %s1717_s19 = scalar_lea.sflag [#allocation5], %s2611_s30 }
  0x70   : > { %v317_v29 = vrot.slane %v313_v11, %v2649_v17  ;;  %v321_v30 = vrot.slane %v313_v11, %v2647_v16  ;;  %v2409_v11 = vmov 0.0|0.0   ;;  %vm3043_vm1 = vcmask 187392   ;;  %s1731_s8 = sshll.u32 %s242_s7, 4  ;;  %p3105_p0 = scmp.ne.s32.totalorder %s3052_s13, 0  ;;  %s2989_s8 = int_to_ptr.vmem [resolvable:$true] %s1731_s8 }
  0x71   : > { %vm2653_vm5 = vcmp.eq.s32.totalorder %v306_v12, 1  ;;  %vm2657_vm6 = vcmp.eq.s32.totalorder %v325_v13, 1  ;;  %vm2671_vm7 = vcmp.eq.s32.totalorder %v302_v26, 1  ;;  %vm2675_vm8 = vcmp.eq.s32.totalorder %v298_v27, 1  ;;  %1928 = vmatprep.subr.bf16.mxu1 %v2409_v11  ;;  %s2324_s25 = scalar_lea.vmem %s2989_s8, 192  ;;  %s2416_s29 = smov [#allocation9]  }
  0x72   : > { %270 = vrot.lane.b32.xlu1 %v248_v0, %s2403_s21  ;;  %266 = vrot.lane.b32.xlu0 %v247_v1, %s2403_s21  ;;  %vm2683_vm9 = vcmp.eq.s32.totalorder %v317_v29, 1  ;;  %vm2687_vm10 = vcmp.eq.s32.totalorder %v321_v30, 1  ;;  %p2325_p11 = scmp.ne.s32.totalorder %s2989_s8, %s2324_s25  ;;  %s2328_s5 = sshll.u32 %s2416_s29, 4  ;;  %s2329_s5 = int_to_ptr.vmem [resolvable:$false] %s2328_s5 }
  0x73   : > { %p2331_p7 = scmp.lt.s32.totalorder %s2989_s8, %s2329_s5 }
  0x74   : > { %p2326_p1 = pnand %p2325_p11, %p3105_p0 }
  0x76   : > { %283 = vrot.lane.b32.xlu1 %v247_v1, %s2401_s23  ;;  %255 = vrot.lane.b32.xlu0 %v247_v1, %s2402_s11  ;;  %p2327_p3 = pneg %p2326_p1 }
  0x7a   : > { %268 = vrot.lane.b32.xlu0 %v254_v2, %s2403_s21 }
  0xdc   : > { %v281_v9 = vpop.permute.xlu1 %280  ;;  %v251_v10 = vpop.permute.xlu0 %250 }
  0xe0   : > { %v286_v14 = vpop.permute.xlu1 %285  ;;  %v258_v15 = vpop.permute.xlu0 %257 }
  0xe1   : > { %v289_v18 = vsel %vm287_vm2, %v286_v14, %v281_v9  ;;  %v261_v19 = vsel %vm259_vm3, %v258_v15, %v251_v10 }
  0xe2   : > { %v312_v25 = vsel %vm2653_vm5, %v289_v18, %v261_v19 }
  0xe4   : > { %v271_v22 = vpop.permute.xlu1 %270  ;;  %v267_v23 = vpop.permute.xlu0 %266 }
  0xe5   : > { %v279_v24 = vsel %vm272_vm4, %v271_v22, %v267_v23 }
  0xe6   : > { %v331_v28 = vsel %vm2657_vm6, %v279_v24, %v312_v25 }
  0xe7   : > { %344 = vrot.lane.b32.xlu1 %v331_v28, %s2405_s6  ;;  %338 = vst [vmem:[#allocation2 + $0xc] sm:$0xf] %v331_v28 }
  0xe8   : > { %v284_v31 = vpop.permute.xlu1 %283  ;;  %v256_v32 = vpop.permute.xlu0 %255 }
  0xe9   : > { %v288_v35 = vsel %vm287_vm2, %v284_v31, %v286_v14  ;;  %v293_v36 = vsel %vm287_vm2, %v281_v9, %v284_v31  ;;  %v260_v37 = vsel %vm259_vm3, %v256_v32, %v258_v15  ;;  %v265_v38 = vsel %vm259_vm3, %v251_v10, %v256_v32 }
  0xea   : > { %v311_v42 = vsel %vm2671_vm7, %v288_v35, %v260_v37  ;;  %v310_v45 = vsel %vm2675_vm8, %v293_v36, %v265_v38  ;;  %v2408_v10 = vmov 0.0  }
  0xeb   : > { %505 = vmatprep.mubr.f32.mxu0 %v2408_v10  ;;  %1884 = vmatprep.mubr.msk.f32.mxu1 %vm2411_vm0, %v2408_v10 }
  0xec   : > { %v269_v41 = vpop.permute.xlu0 %268 }
  0xed   : > { %v273_v43 = vsel %vm272_vm4, %v267_v23, %v269_v41  ;;  %v274_v44 = vsel %vm272_vm4, %v269_v41, %v271_v22 }
  0xee   : > { %v329_v46 = vsel %vm2683_vm9, %v273_v43, %v310_v45  ;;  %v330_v47 = vsel %vm2687_vm10, %v274_v44, %v311_v42 }
  0xef   : > { %339 = vrot.lane.b32.xlu0 %v329_v46, %s2406_s26  ;;  %v335_v48 = vcombine.low %v329_v46, %v330_v47  ;;  %v2234_v49 = vcombine.low %v329_v46, %v329_v46  ;;  %v2235_v50 = vcombine.low %v330_v47, %v330_v47 }
  0xf1   : > { %337 = vst [vmem:[#allocation2 + $0x4] sm:$0xff] %v335_v48  ;;  %363 = vrot.lane.b32.xlu1 %v2234_v49, %s2407_s10  ;;  %v2086_v51 = vpack.i.bf16 %v2235_v50, %v335_v48 }
  0xf3   : > { %365 = vrot.lane.b32.xlu0 %v335_v48, %s2407_s10 }
  0xf7   : > { %2087 = vrot.lane.b32.xlu0 %v2086_v51, %s2406_s26 }
  0xf8   : > { %v350_v2 = vld [vmem:[#allocation2 + $0x8] sm:$0xff] }
  0xf9   : > { %v356_v23 = vcombine.high %v350_v2, %v350_v2 }
 0x159   : > { %v345_v52 = vpop.permute.xlu1 %344 }
 0x15a   : > { %348 = vst.msk [vmem:[#allocation2 + $0x10] sm:$0xf] %vm3046_vm11, %v345_v52 }
 0x161   : > { %v340_v53 = vpop.permute.xlu0 %339  ;;  %v352_v54 = vld [vmem:[#allocation2 + $0xc] sm:$0xff] }
 0x162   : > { %343 = vst.msk [vmem:[#allocation2] sm:$0xf] %vm3042_vm12, %v340_v53  ;;  %369 = vrot.lane.b32.xlu0 %v352_v54, %s2407_s10  ;;  %v362_v55 = vcombine.low %v352_v54, %v352_v54  ;;  %v380_v56 = vcombine.high %v352_v54, %v352_v54  ;;  %vm431_vm12 = vcmask 97280  }
 0x163   : > { %v364_v59 = vpop.permute.xlu1 %363 }
 0x164   : > { %367 = vrot.lane.b32.xlu1 %v362_v55, %s2407_s10  ;;  %v400_v55 = vld [vmem:[#allocation6 + $0x4] sm:$0xf] }
 0x165   : > { %v366_v57 = vpop.permute.xlu0 %365 }
 0x166   : > { %v372_v63 = vsel %vm3041_vm13, %v364_v59, %v366_v57 }
 0x168   : > { %385 = vrot.lane.b32.xlu1 %v352_v54, %s2406_s26 }
 0x169   : > { %v349_v58 = vld [vmem:[#allocation2] sm:$0xff]  ;;  %v2088_v61 = vpop.permute.xlu0 %2087 }
 0x16a   : > { %v355_v60 = vcombine.high %v349_v58, %v349_v58  ;;  %v2090_v0 = vunpack.i.h.bf16 %v2088_v61  ;;  %v2089_v1 = vunpack.i.l.bf16 %v2088_v61  ;;  %v2724_v12 = vsel %vm393_vm14, %v349_v58, %v364_v59 }
 0x16c   : > { %387 = vrot.lane.b32.xlu1 %v380_v56, %s2406_s26  ;;  %v2714_v5 = vsel %vm393_vm14, %v355_v60, %v372_v63  ;;  %v390_v18 = vsel %vm3040_vm15, %v2089_v1, %v2090_v0  ;;  %v2101_v24 = vpack.i.bf16 %v2089_v1, %v2724_v12 }
 0x1d4   : > { %v370_v14 = vpop.permute.xlu0 %369 }
 0x1d6   : > { %v368_v62 = vpop.permute.xlu1 %367 }
 0x1d7   : > { %v373_v3 = vsel %vm3041_vm13, %v366_v57, %v368_v62  ;;  %v374_v19 = vsel %vm3041_vm13, %v368_v62, %v370_v14 }
 0x1d8   : > { %v2717_v8 = vsel %vm393_vm14, %v350_v2, %v373_v3  ;;  %v2735_v26 = vsel %vm393_vm14, %v356_v23, %v374_v19 }
 0x1d9   : > { %v2096_v9 = vpack.i.bf16 %v2717_v8, %v2714_v5 }
 0x1da   : > { %v386_v13 = vpop.permute.xlu1 %385 }
 0x1db   : > { %v391_v15 = vsel %vm3040_vm15, %v2090_v0, %v386_v13  ;;  %2097 = vrot.lane.b32.xlu0 %v2096_v9, %s2410_s28 }
 0x1dc   : > { %v2091_v22 = vpack.i.bf16 %v391_v15, %v390_v18 }
 0x1de   : > { %2092 = vrot.lane.b32.xlu1 %v2091_v22, %s2410_s28  ;;  %v388_v25 = vpop.permute.xlu1 %387 }
 0x1df   : > { %v392_v27 = vsel %vm3040_vm15, %v386_v13, %v388_v25  ;;  %2102 = vrot.lane.b32.xlu0 %v2101_v24, %s2410_s28  ;;  %vm2414_vm15 = vmmov 1  }
 0x1e0   : > { %v2106_v28 = vpack.i.bf16 %v392_v27, %v2735_v26  ;;  %vm2752_vm13 = vmpackc.low %vm393_vm14, %vm2414_vm15  ;;  %vm3045_vm15 = vcmask 195584  }
 0x1e2   : > { %2107 = vrot.lane.b32.xlu1 %v2106_v28, %s2410_s28 }
 0x1e3   : > { %2117 = vrot.lane.b32.xlu0 %v2096_v9, %s2412_s20 }
 0x1e6   : > { %2112 = vrot.lane.b32.xlu1 %v2091_v22, %s2412_s20 }
 0x1e7   : > { %2122 = vrot.lane.b32.xlu0 %v2101_v24, %s2412_s20 }
 0x1ea   : > { %2127 = vrot.lane.b32.xlu1 %v2106_v28, %s2412_s20 }
 0x1eb   : > { %2137 = vrot.lane.b32.xlu0 %v2096_v9, %s2413_s24 }
 0x1ee   : > { %2132 = vrot.lane.b32.xlu1 %v2091_v22, %s2413_s24 }
 0x1ef   : > { %2142 = vrot.lane.b32.xlu0 %v2101_v24, %s2413_s24 }
 0x1f2   : > { %2147 = vrot.lane.b32.xlu1 %v2106_v28, %s2413_s24  ;;  %v398_v28 = vld [vmem:[#allocation6] sm:$0xf] }
 0x24d   : > { %v2098_v29 = vpop.permute.xlu0 %2097 }
 0x24e   : > { %v2100_v30 = vunpack.i.h.bf16 %v2098_v29  ;;  %v2099_v31 = vunpack.i.l.bf16 %v2098_v29 }
 0x250   : > { %v2093_v32 = vpop.permute.xlu1 %2092  ;;  %v423_v42 = vsel %vm3043_vm1, %v2099_v31, %v2100_v30 }
 0x251   : > { %v2095_v35 = vunpack.i.h.bf16 %v2093_v32  ;;  %v2094_v36 = vunpack.i.l.bf16 %v2093_v32  ;;  %v2103_v37 = vpop.permute.xlu0 %2102 }
 0x252   : > { %v2105_v38 = vunpack.i.h.bf16 %v2103_v37  ;;  %v2104_v41 = vunpack.i.l.bf16 %v2103_v37 }
 0x253   : > { %v426_v43 = vsel %vm3043_vm1, %v2094_v36, %v2095_v35 }
 0x254   : > { %v2108_v45 = vpop.permute.xlu1 %2107  ;;  %v1922_v46 = vpack.c.bf16 %v426_v43, %v423_v42  ;;  %v422_v47 = vsel %vm3043_vm1, %v2104_v41, %v2099_v31  ;;  %v425_v48 = vsel %vm3043_vm1, %v2105_v38, %v2094_v36 }
 0x255   : > { %v2110_v49 = vunpack.i.h.bf16 %v2108_v45  ;;  %v2109_v50 = vunpack.i.l.bf16 %v2108_v45  ;;  %v2118_v51 = vpop.permute.xlu0 %2117  ;;  %v1925_v52 = vpack.c.bf16 %v425_v48, %v422_v47 }
 0x256   : > { %1924 = vmatprep.subr.msk.bf16.mxu0 %vm2752_vm13, %v1922_v46  ;;  %v2120_v53 = vunpack.i.h.bf16 %v2118_v51  ;;  %v2119_v54 = vunpack.i.l.bf16 %v2118_v51 }
 0x257   : > { %1927 = vmatpush1.bf16.msk.msra.mxu0 %vm2752_vm13, %v1925_v52  ;;  %v424_v56 = vsel %vm3043_vm1, %v2100_v30, %v2109_v50  ;;  %v427_v57 = vsel %vm3043_vm1, %v2095_v35, %v2110_v49  ;;  %vm3044_vm1 = vcmask 179200   ;;  %v759_v52 = vld [vmem:[#allocation6 + $0x8] sm:$0xf] }
 0x258   : > { %v2113_v58 = vpop.permute.xlu1 %2112  ;;  %v1929_v59 = vpack.c.bf16 %v427_v57, %v424_v56  ;;  %v600_v1 = vsel %vm3045_vm15, %v2119_v54, %v2120_v53 }
 0x259   : > { %v2115_v60 = vunpack.i.h.bf16 %v2113_v58  ;;  %v2114_v61 = vunpack.i.l.bf16 %v2113_v58  ;;  %v2123_v62 = vpop.permute.xlu0 %2122 }
 0x25a   : > { %v2125_v63 = vunpack.i.h.bf16 %v2123_v62  ;;  %v2124_v0 = vunpack.i.l.bf16 %v2123_v62  ;;  %1831 = vmatmul.mubr.msk.f32.vlgmr.msra.gmra.mrb[0].mxu0 %vm431_vm12, %v400_v55  ;;  %1931 = vmatpush3.bf16.msk.msra.mxu1 %vm2752_vm13, %v1929_v59 }
 0x25b   : > { %v603_v2 = vsel %vm3045_vm15, %v2114_v61, %v2115_v60  ;;  %681 = vmatprep.mubr.f32.mxu0 %v2408_v10  ;;  %1938 = vmatprep.subr.bf16.mxu1 %v2409_v11 }
 0x25c   : > { %v1932_v3 = vpack.c.bf16 %v603_v2, %v600_v1  ;;  %v602_v9 = vsel %vm3045_vm15, %v2125_v63, %v2114_v61  ;;  %v599_v13 = vsel %vm3045_vm15, %v2124_v0, %v2119_v54  ;;  %v2128_v14 = vpop.permute.xlu1 %2127 }
 0x25d   : > { %v1935_v15 = vpack.c.bf16 %v602_v9, %v599_v13  ;;  %v2130_v18 = vunpack.i.h.bf16 %v2128_v14  ;;  %v2129_v19 = vunpack.i.l.bf16 %v2128_v14  ;;  %v2138_v22 = vpop.permute.xlu0 %2137  ;;  %1885 = vmatmul.mubr.msk.f32.vlgmr.msra.gmra.mrb[0].mxu1 %vm431_vm12, %v400_v55 }
 0x25e   : > { %1934 = vmatprep.subr.msk.bf16.mxu0 %vm2752_vm13, %v1932_v3  ;;  %1891 = vmatprep.mubr.msk.f32.mxu1 %vm2411_vm0, %v2408_v10  ;;  %v2140_v25 = vunpack.i.h.bf16 %v2138_v22  ;;  %v2139_v27 = vunpack.i.l.bf16 %v2138_v22 }
 0x25f   : > { %v601_v23 = vsel %vm3045_vm15, %v2120_v53, %v2129_v19  ;;  %v604_v24 = vsel %vm3045_vm15, %v2115_v60, %v2130_v18  ;;  %1937 = vmatpush1.bf16.msk.msra.mxu0 %vm2752_vm13, %v1935_v15 }
 0x260   : > { %v1939_v29 = vpack.c.bf16 %v604_v24, %v601_v23  ;;  %v2133_v30 = vpop.permute.xlu1 %2132  ;;  %v778_v38 = vsel %vm3044_vm1, %v2139_v27, %v2140_v25 }
 0x261   : > { %v2135_v31 = vunpack.i.h.bf16 %v2133_v30  ;;  %v2134_v32 = vunpack.i.l.bf16 %v2133_v30  ;;  %v2143_v35 = vpop.permute.xlu0 %2142 }
 0x262   : > { %v2145_v36 = vunpack.i.h.bf16 %v2143_v35  ;;  %v2144_v37 = vunpack.i.l.bf16 %v2143_v35  ;;  %1836 = vmatmul.mubr.msk.f32.vlgmr.msra.gmra.mrb[0].mxu0 %vm431_vm12, %v398_v28  ;;  %1941 = vmatpush3.bf16.msk.msra.mxu1 %vm2752_vm13, %v1939_v29 }
 0x263   : > { %v781_v41 = vsel %vm3044_vm1, %v2134_v32, %v2135_v31  ;;  %859 = vmatprep.mubr.f32.mxu0 %v2408_v10  ;;  %1948 = vmatprep.subr.bf16.mxu1 %v2409_v11 }
 0x264   : > { %v1942_v42 = vpack.c.bf16 %v781_v41, %v778_v38  ;;  %v780_v43 = vsel %vm3044_vm1, %v2145_v36, %v2134_v32  ;;  %v777_v45 = vsel %vm3044_vm1, %v2144_v37, %v2139_v27  ;;  %v2148_v46 = vpop.permute.xlu1 %2147 }
 0x265   : > { %v1945_v47 = vpack.c.bf16 %v780_v43, %v777_v45  ;;  %v2150_v48 = vunpack.i.h.bf16 %v2148_v46  ;;  %v2149_v49 = vunpack.i.l.bf16 %v2148_v46  ;;  %1892 = vmatmul.mubr.msk.f32.vlgmr.msra.gmra.mrb[0].mxu1 %vm431_vm12, %v398_v28 }
 0x266   : > { %1944 = vmatprep.subr.msk.bf16.mxu0 %vm2752_vm13, %v1942_v42  ;;  %1898 = vmatprep.mubr.msk.f32.mxu1 %vm2411_vm0, %v2408_v10 }
 0x267   : > { %v779_v50 = vsel %vm3044_vm1, %v2140_v25, %v2149_v49  ;;  %v782_v51 = vsel %vm3044_vm1, %v2135_v31, %v2150_v48  ;;  %1947 = vmatpush1.bf16.msk.msra.mxu0 %vm2752_vm13, %v1945_v47  ;;  %vm244_vm1 = vcmp.lt.s32.totalorder %v2637_v4, 16 }
 0x268   : > { %v1949_v53 = vpack.c.bf16 %v782_v51, %v779_v50  ;;  %v939_v54 = vsel %vm244_vm1, 1, %v2404_v7 }
 0x269   : > { %v943_v55 = vrot.slane %v939_v54, %v2649_v17  ;;  %v947_v56 = vrot.slane %v939_v54, %v2647_v16  ;;  %v951_v57 = vrot.slane %v939_v54, %v2641_v6 }
 0x26a   : > { %1841 = vmatmul.mubr.msk.f32.vlgmr.msra.gmra.mrb[0].mxu0 %vm431_vm12, %v759_v52  ;;  %1951 = vmatpush3.bf16.msk.msra.mxu1 %vm2752_vm13, %v1949_v53 }
 0x26b   : > { %1205 = vmatprep.mubr.f32.mxu0 %v2408_v10  ;;  %1958 = vmatprep.subr.bf16.mxu1 %v2409_v11  ;;  %vm2813_vm15 = vcmp.eq.s32.totalorder %v943_v55, 1  ;;  %vm2817_vm11 = vcmp.eq.s32.totalorder %v947_v56, 1  ;;  %vm2823_vm1 = vcmp.eq.s32.totalorder %v951_v57, 1 }
 0x26d   : > { %1899 = vmatmul.mubr.msk.f32.vlgmr.msra.gmra.mrb[0].mxu1 %vm431_vm12, %v759_v52 }
 0x26e   : > { %1905 = vmatprep.mubr.msk.f32.mxu1 %vm2411_vm0, %v2408_v10 }
 0x33d   : > { %v861_v60 = vpop.f32.mrb[0].mxu0 }
 0x33e   : > { %v955_v4 = vsel %vm2813_vm15, %v861_v60, 0.0  ;;  %v863_v61 = vpop.f32.mrb[1].mxu0 }
 0x33f   : > { %v958_v16 = vsel %vm393_vm14, %v955_v4, 0.0  ;;  %v956_v6 = vsel %vm2817_vm11, %v863_v61, 0.0 }
 0x340   : > { %v959_v17 = vsel %vm393_vm14, %v956_v6, 0.0  ;;  %v932_v62 = vpop.f32.mrb[0].mxu1 }
 0x341   : > { %v957_v63 = vsel %vm2823_vm1, %v932_v62, 0.0  ;;  %v1900_v0 = vpop.f32.mrb[1].mxu1  ;;  %v960_v1 = vadd.f32 %v959_v17, %v958_v16 }
 0x342   : > { %v961_v2 = vsel %vm393_vm14, %v957_v63, 0.0 }
 0x343   : > { %v962_v3 = vadd.f32 %v961_v2, %v960_v1 }
 0x345   : > { %963 = vadd.xlane.f32.xlu0 %v962_v3 }
 0x3d2   : > { %v964_v9 = vpop.xlane.xlu0 %963 }
 0x3d3   : > { %v965_v13 = vmul.f32 0.00390625, %v964_v9 }
 0x3d5   : > { %v966_v14 = vsub.f32 %v861_v60, %v965_v13  ;;  %v967_v15 = vsub.f32 %v863_v61, %v965_v13  ;;  %v968_v18 = vsub.f32 %v932_v62, %v965_v13 }
 0x3d7   : > { %v969_v19 = vsel %vm2813_vm15, %v966_v14, 0.0  ;;  %v970_v22 = vsel %vm2817_vm11, %v967_v15, 0.0  ;;  %v971_v23 = vsel %vm2823_vm1, %v968_v18, 0.0 }
 0x3d8   : > { %v972_v24 = vmul.f32 %v969_v19, %v969_v19  ;;  %v973_v25 = vmul.f32 %v970_v22, %v970_v22  ;;  %v974_v27 = vmul.f32 %v971_v23, %v971_v23 }
 0x3da   : > { %v975_v28 = vsel %vm393_vm14, %v972_v24, 0.0  ;;  %v976_v29 = vsel %vm393_vm14, %v973_v25, 0.0  ;;  %v978_v31 = vsel %vm393_vm14, %v974_v27, 0.0 }
 0x3db   : > { %v977_v30 = vadd.f32 %v976_v29, %v975_v28 }
 0x3dd   : > { %v979_v32 = vadd.f32 %v978_v31, %v977_v30 }
 0x3df   : > { %980 = vadd.xlane.f32.xlu1 %v979_v32 }
 0x46c   : > { %v981_v35 = vpop.xlane.xlu1 %980 }
 0x46d   : > { %v982_v36 = vmul.f32 0.00390625, %v981_v35 }
 0x46f   : > { %v983_v37 = vadd.f32 1e-05, %v982_v36 }
 0x471   : > { %2230 = vrsqrt.f32 %v983_v37 }
 0x47b   : > { %v2231_v38 = vpop.eup %2230 }
 0x47c   : > { %v987_v41 = vmul.f32 %v2231_v38, %v968_v18  ;;  %v986_v42 = vmul.f32 %v2231_v38, %v967_v15  ;;  %v985_v46 = vmul.f32 %v2231_v38, %v966_v14 }
 0x47e   : > { %v990_v43 = vmax.f32 %v987_v41, 0.0  ;;  %v989_v45 = vmax.f32 %v986_v42, 0.0  ;;  %v988_v47 = vmax.f32 %v985_v46, 0.0 }
 0x480   : > { %992 = vrot.lane.b32.xlu0 %v990_v43, %s2402_s11  ;;  %999 = vrot.lane.b32.xlu1 %v989_v45, %s2402_s11 }
 0x484   : > { %1020 = vrot.lane.b32.xlu0 %v990_v43, %s2401_s23  ;;  %1025 = vrot.lane.b32.xlu1 %v989_v45, %s2401_s23 }
 0x488   : > { %1011 = vrot.lane.b32.xlu1 %v990_v43, %s2403_s21  ;;  %1007 = vrot.lane.b32.xlu0 %v988_v47, %s2403_s21 }
 0x48c   : > { %1023 = vrot.lane.b32.xlu1 %v988_v47, %s2401_s23  ;;  %997 = vrot.lane.b32.xlu0 %v988_v47, %s2402_s11 }
 0x490   : > { %1009 = vrot.lane.b32.xlu0 %v989_v45, %s2403_s21  ;;  %s2987_s21 = scalar_lea.hbm %s3036_s4, %s2001_s27 }
 0x4f2   : > { %v993_v48 = vpop.permute.xlu0 %992  ;;  %v1000_v49 = vpop.permute.xlu1 %999 }
 0x4f3   : > { %v1002_v53 = vsel %vm259_vm3, %v1000_v49, %v993_v48 }
 0x4f6   : > { %v1021_v50 = vpop.permute.xlu0 %1020  ;;  %v1026_v51 = vpop.permute.xlu1 %1025 }
 0x4f7   : > { %v1028_v52 = vsel %vm287_vm2, %v1026_v51, %v1021_v50 }
 0x4f8   : > { %v1035_v57 = vsel %vm2653_vm5, %v1028_v52, %v1002_v53 }
 0x4fa   : > { %v1012_v54 = vpop.permute.xlu1 %1011  ;;  %v1008_v55 = vpop.permute.xlu0 %1007 }
 0x4fb   : > { %v1019_v56 = vsel %vm272_vm4, %v1012_v54, %v1008_v55 }
 0x4fc   : > { %v1038_v60 = vsel %vm2657_vm6, %v1019_v56, %v1035_v57  ;;  %vm3081_vm6 = vcmask 654336  }
 0x4fd   : > { %1050 = vrot.lane.b32.xlu1 %v1038_v60, %s2405_s6  ;;  %1045 = vst [vmem:[#allocation2 + $0xc] sm:$0xf] %v1038_v60  ;;  %s2330_s6 = scalar_lea.vmem %s2329_s5, 384 }
 0x4fe   : > { %v1024_v4 = vpop.permute.xlu1 %1023  ;;  %v998_v61 = vpop.permute.xlu0 %997  ;;  %p2332_p9 = scmp.lt.s32.totalorder %s2330_s6, %s2324_s25 }
 0x4ff   : > { %v1027_v16 = vsel %vm287_vm2, %v1024_v4, %v1026_v51  ;;  %v1032_v6 = vsel %vm287_vm2, %v1021_v50, %v1024_v4  ;;  %v1001_v17 = vsel %vm259_vm3, %v998_v61, %v1000_v49  ;;  %v1006_v62 = vsel %vm259_vm3, %v993_v48, %v998_v61 }
 0x500   : > { %v1034_v20 = vsel %vm2671_vm7, %v1027_v16, %v1001_v17  ;;  %v1033_v1 = vsel %vm2675_vm8, %v1032_v6, %v1006_v62  ;;  %vm3077_vm2 = vcmask 191488   ;;  %vm3078_vm3 = vcmask 1044288   ;;  %vm3082_vm7 = vmmov %vm3081_vm6  ;;  %p2333_p12 = por %p2332_p9, %p2331_p7 }
 0x502   : > { %v1010_v63 = vpop.permute.xlu0 %1009  ;;  %p2334_p2 = pnand %p2333_p12, %p2327_p3 }
 0x503   : > { %v1013_v21 = vsel %vm272_vm4, %v1008_v55, %v1010_v63  ;;  %v1014_v0 = vsel %vm272_vm4, %v1010_v63, %v1012_v54  ;;  %vm3079_vm4 = vcmask 850944  }
 0x504   : > { %v1036_v2 = vsel %vm2683_vm9, %v1013_v21, %v1033_v1  ;;  %v1037_v3 = vsel %vm2687_vm10, %v1014_v0, %v1034_v20  ;;  %vm3080_vm5 = vmmov %vm3079_vm4  ;;  %vm3085_vm10 = vcmask 187392  }
 0x505   : > { %1046 = vrot.lane.b32.xlu0 %v1036_v2, %s2406_s26  ;;  %v1042_v9 = vcombine.low %v1036_v2, %v1037_v3  ;;  %v2236_v13 = vcombine.low %v1036_v2, %v1036_v2  ;;  %v2237_v14 = vcombine.low %v1037_v3, %v1037_v3  ;;  %vm3083_vm8 = vmmov %vm3079_vm4 }
 0x506   : > { %vm3084_vm9 = vmmov %vm3081_vm6 }
 0x507   : > { %1044 = vst [vmem:[#allocation2 + $0x4] sm:$0xff] %v1042_v9  ;;  %v2151_v33 = vpack.i.bf16 %v1042_v9, %v2236_v13  ;;  %v2156_v15 = vpack.i.bf16 %v2237_v14, %v1042_v9 }
 0x509   : > { %2152 = vrot.lane.b32.xlu1 %v2151_v33, %s2407_s10 }
 0x50d   : > { %2157 = vrot.lane.b32.xlu1 %v2156_v15, %s2406_s26 }
 0x50e   : > { %v1055_v35 = vld [vmem:[#allocation2 + $0x8] sm:$0xff] }
 0x50f   : > { %v1061_v50 = vcombine.high %v1055_v35, %v1055_v35 }
 0x56f   : > { %v1051_v34 = vpop.permute.xlu1 %1050 }
 0x570   : > { %1053 = vst.msk [vmem:[#allocation2 + $0x10] sm:$0xf] %vm3077_vm2, %v1051_v34  ;;  %vm3086_vm2 = vmmov %vm3085_vm10 }
 0x577   : > { %v1047_v39 = vpop.permute.xlu0 %1046  ;;  %v1057_v18 = vld [vmem:[#allocation2 + $0xc] sm:$0xff] }
 0x578   : > { %1049 = vst.msk [vmem:[#allocation2] sm:$0xf] %vm3078_vm3, %v1047_v39  ;;  %1074 = vrot.lane.b32.xlu1 %v1057_v18, %s2407_s10  ;;  %v1067_v40 = vcombine.low %v1057_v18, %v1057_v18  ;;  %v1084_v19 = vcombine.high %v1057_v18, %v1057_v18  ;;  %vm3087_vm3 = vmmov %vm3086_vm2 }
 0x57a   : > { %1072 = vrot.lane.b32.xlu0 %v1067_v40, %s2407_s10 }
 0x57b   : > { %v2153_v22 = vpop.permute.xlu1 %2152 }
 0x57c   : > { %v2155_v23 = vunpack.i.h.bf16 %v2153_v22  ;;  %v2154_v24 = vunpack.i.l.bf16 %v2153_v22 }
 0x57e   : > { %1089 = vrot.lane.b32.xlu0 %v1057_v18, %s2406_s26  ;;  %v1076_v29 = vsel %vm3079_vm4, %v2154_v24, %v2155_v23  ;;  %vm3088_vm4 = vmmov %vm3086_vm2  ;;  %v1102_v18 = vld [vmem:[#allocation8 + $0x4] sm:$0xf] }
 0x57f   : > { %v1054_v25 = vld [vmem:[#allocation2] sm:$0xff]  ;;  %v2158_v27 = vpop.permute.xlu1 %2157 }
 0x580   : > { %v1060_v28 = vcombine.high %v1054_v25, %v1054_v25  ;;  %v2160_v31 = vunpack.i.h.bf16 %v2158_v27  ;;  %v2159_v32 = vunpack.i.l.bf16 %v2158_v27  ;;  %v1096_v49 = vsel %vm393_vm14, %v1054_v25, %v2154_v24 }
 0x582   : > { %1091 = vrot.lane.b32.xlu0 %v1084_v19, %s2406_s26  ;;  %v1097_v38 = vsel %vm393_vm14, %v1060_v28, %v1076_v29  ;;  %v1093_v46 = vsel %vm3082_vm7, %v2159_v32, %v2160_v31  ;;  %v2171_v51 = vpack.i.bf16 %v2159_v32, %v1096_v49  ;;  %vm3091_vm7 = vcmask 195584  }
 0x5ea   : > { %v1075_v43 = vpop.permute.xlu1 %1074 }
 0x5ec   : > { %v1073_v30 = vpop.permute.xlu0 %1072 }
 0x5ed   : > { %v1077_v36 = vsel %vm3080_vm5, %v2155_v23, %v1073_v30  ;;  %v1078_v47 = vsel %vm3083_vm8, %v1073_v30, %v1075_v43  ;;  %vm3089_vm5 = vmmov %vm3086_vm2 }
 0x5ee   : > { %v1098_v37 = vsel %vm393_vm14, %v1055_v35, %v1077_v36  ;;  %v1099_v53 = vsel %vm393_vm14, %v1061_v50, %v1078_v47  ;;  %vm3092_vm8 = vmmov %vm3091_vm7  ;;  %v1100_v47 = vld [vmem:[#allocation8] sm:$0xf] }
 0x5ef   : > { %v2166_v41 = vpack.i.bf16 %v1098_v37, %v1097_v38 }
 0x5f0   : > { %v1090_v42 = vpop.permute.xlu0 %1089 }
 0x5f1   : > { %v1094_v45 = vsel %vm3081_vm6, %v2160_v31, %v1090_v42  ;;  %2167 = vrot.lane.b32.xlu1 %v2166_v41, %s2410_s28  ;;  %vm3090_vm6 = vmmov %vm3086_vm2 }
 0x5f2   : > { %v2161_v48 = vpack.i.bf16 %v1094_v45, %v1093_v46 }
 0x5f4   : > { %v1092_v52 = vpop.permute.xlu0 %1091  ;;  %2162 = vrot.lane.b32.xlu0 %v2161_v48, %s2410_s28 }
 0x5f5   : > { %v1095_v54 = vsel %vm3084_vm9, %v1090_v42, %v1092_v52  ;;  %2172 = vrot.lane.b32.xlu1 %v2171_v51, %s2410_s28  ;;  %vm3093_vm9 = vmmov %vm3091_vm7 }
 0x5f6   : > { %v2176_v55 = vpack.i.bf16 %v1095_v54, %v1099_v53 }
 0x5f8   : > { %2177 = vrot.lane.b32.xlu0 %v2176_v55, %s2410_s28 }
 0x5f9   : > { %2187 = vrot.lane.b32.xlu1 %v2166_v41, %s2412_s20 }
 0x5fc   : > { %2182 = vrot.lane.b32.xlu0 %v2161_v48, %s2412_s20 }
 0x5fd   : > { %2192 = vrot.lane.b32.xlu1 %v2171_v51, %s2412_s20 }
 0x600   : > { %2197 = vrot.lane.b32.xlu0 %v2176_v55, %s2412_s20 }
 0x601   : > { %2207 = vrot.lane.b32.xlu1 %v2166_v41, %s2413_s24 }
 0x604   : > { %2202 = vrot.lane.b32.xlu0 %v2161_v48, %s2413_s24 }
 0x605   : > { %2212 = vrot.lane.b32.xlu1 %v2171_v51, %s2413_s24 }
 0x608   : > { %2217 = vrot.lane.b32.xlu0 %v2176_v55, %s2413_s24 }
 0x663   : > { %v2168_v56 = vpop.permute.xlu1 %2167 }
 0x664   : > { %v2170_v57 = vunpack.i.h.bf16 %v2168_v56  ;;  %v2169_v60 = vunpack.i.l.bf16 %v2168_v56 }
 0x666   : > { %v2163_v4 = vpop.permute.xlu0 %2162  ;;  %v1124_v63 = vsel %vm3085_vm10, %v2169_v60, %v2170_v57  ;;  %vm3094_vm10 = vmmov %vm3091_vm7 }
 0x667   : > { %v2165_v61 = vunpack.i.h.bf16 %v2163_v4  ;;  %v2164_v16 = vunpack.i.l.bf16 %v2163_v4  ;;  %v2173_v6 = vpop.permute.xlu1 %2172 }
 0x668   : > { %v2175_v17 = vunpack.i.h.bf16 %v2173_v6  ;;  %v2174_v62 = vunpack.i.l.bf16 %v2173_v6 }
 0x669   : > { %v1127_v20 = vsel %vm3086_vm2, %v2164_v16, %v2165_v61  ;;  %vm3095_vm2 = vmmov %vm3091_vm7 }
 0x66a   : > { %v1952_v21 = vpack.c.bf16 %v1127_v20, %v1124_v63  ;;  %v1126_v0 = vsel %vm3087_vm3, %v2175_v17, %v2164_v16  ;;  %v1123_v1 = vsel %vm3088_vm4, %v2174_v62, %v2169_v60  ;;  %v2178_v2 = vpop.permute.xlu0 %2177  ;;  %vm3096_vm3 = vmmov %vm3095_vm2  ;;  %vm3097_vm4 = vcmask 179200   ;;  %v1458_v63 = vld [vmem:[#allocation8 + $0x8] sm:$0xf] }
 0x66b   : > { %v1955_v3 = vpack.c.bf16 %v1126_v0, %v1123_v1  ;;  %v2180_v9 = vunpack.i.h.bf16 %v2178_v2  ;;  %v2179_v13 = vunpack.i.l.bf16 %v2178_v2  ;;  %v2188_v33 = vpop.permute.xlu1 %2187 }
 0x66c   : > { %1954 = vmatprep.subr.msk.bf16.mxu0 %vm2752_vm13, %v1952_v21  ;;  %v2190_v34 = vunpack.i.h.bf16 %v2188_v33  ;;  %v2189_v39 = vunpack.i.l.bf16 %v2188_v33 }
 0x66d   : > { %v1128_v14 = vsel %vm3089_vm5, %v2165_v61, %v2180_v9  ;;  %v1125_v15 = vsel %vm3090_vm6, %v2170_v57, %v2179_v13  ;;  %1957 = vmatpush1.bf16.msk.msra.mxu0 %vm2752_vm13, %v1955_v3  ;;  %vm3098_vm5 = vmmov %vm3097_vm4 }
 0x66e   : > { %v1959_v40 = vpack.c.bf16 %v1128_v14, %v1125_v15  ;;  %v2183_v19 = vpop.permute.xlu0 %2182  ;;  %v1299_v28 = vsel %vm3091_vm7, %v2189_v39, %v2190_v34  ;;  %vm3099_vm6 = vmmov %vm3097_vm4 }
 0x66f   : > { %v2185_v22 = vunpack.i.h.bf16 %v2183_v19  ;;  %v2184_v23 = vunpack.i.l.bf16 %v2183_v19  ;;  %v2193_v24 = vpop.permute.xlu1 %2192  ;;  %vm3100_vm7 = vmmov %vm3097_vm4 }
 0x670   : > { %v2195_v25 = vunpack.i.h.bf16 %v2193_v24  ;;  %v2194_v27 = vunpack.i.l.bf16 %v2193_v24  ;;  %1846 = vmatmul.mubr.msk.f32.vlgmr.msra.gmra.mrb[2].mxu0 %vm431_vm12, %v1102_v18  ;;  %1961 = vmatpush3.bf16.msk.msra.mxu1 %vm2752_vm13, %v1959_v40 }
 0x671   : > { %v1302_v29 = vsel %vm3092_vm8, %v2184_v23, %v2185_v22  ;;  %1380 = vmatprep.mubr.f32.mxu0 %v2408_v10  ;;  %1968 = vmatprep.subr.bf16.mxu1 %v2409_v11  ;;  %vm3101_vm8 = vmmov %vm3097_vm4 }
 0x672   : > { %v1962_v30 = vpack.c.bf16 %v1302_v29, %v1299_v28  ;;  %v1301_v31 = vsel %vm3093_vm9, %v2195_v25, %v2184_v23  ;;  %v1298_v32 = vsel %vm3094_vm10, %v2194_v27, %v2189_v39  ;;  %v2198_v35 = vpop.permute.xlu0 %2197  ;;  %vm3102_vm9 = vmmov %vm3097_vm4 }
 0x673   : > { %v1965_v36 = vpack.c.bf16 %v1301_v31, %v1298_v32  ;;  %v2200_v37 = vunpack.i.h.bf16 %v2198_v35  ;;  %v2199_v38 = vunpack.i.l.bf16 %v2198_v35  ;;  %v2208_v41 = vpop.permute.xlu1 %2207  ;;  %1906 = vmatmul.mubr.msk.f32.vlgmr.msra.gmra.mrb[2].mxu1 %vm431_vm12, %v1102_v18 }
 0x674   : > { %1964 = vmatprep.subr.msk.bf16.mxu0 %vm2752_vm13, %v1962_v30  ;;  %1912 = vmatprep.mubr.msk.f32.mxu1 %vm2411_vm0, %v2408_v10  ;;  %v2210_v45 = vunpack.i.h.bf16 %v2208_v41  ;;  %v2209_v46 = vunpack.i.l.bf16 %v2208_v41 }
 0x675   : > { %v1300_v42 = vsel %vm3095_vm2, %v2190_v34, %v2199_v38  ;;  %v1303_v43 = vsel %vm3096_vm3, %v2185_v22, %v2200_v37  ;;  %1967 = vmatpush1.bf16.msk.msra.mxu0 %vm2752_vm13, %v1965_v36 }
 0x676   : > { %v1969_v48 = vpack.c.bf16 %v1303_v43, %v1300_v42  ;;  %v2203_v49 = vpop.permute.xlu0 %2202  ;;  %v1476_v55 = vsel %vm3097_vm4, %v2209_v46, %v2210_v45 }
 0x677   : > { %v2205_v50 = vunpack.i.h.bf16 %v2203_v49  ;;  %v2204_v51 = vunpack.i.l.bf16 %v2203_v49  ;;  %v2213_v52 = vpop.permute.xlu1 %2212 }
 0x678   : > { %v2215_v53 = vunpack.i.h.bf16 %v2213_v52  ;;  %v2214_v54 = vunpack.i.l.bf16 %v2213_v52  ;;  %1851 = vmatmul.mubr.msk.f32.vlgmr.msra.gmra.mrb[2].mxu0 %vm431_vm12, %v1100_v47  ;;  %1971 = vmatpush3.bf16.msk.msra.mxu1 %vm2752_vm13, %v1969_v48 }
 0x679   : > { %v1479_v56 = vsel %vm3098_vm5, %v2204_v51, %v2205_v50  ;;  %1557 = vmatprep.mubr.f32.mxu0 %v2408_v10  ;;  %1978 = vmatprep.subr.bf16.mxu1 %v2409_v11 }
 0x67a   : > { %v1972_v57 = vpack.c.bf16 %v1479_v56, %v1476_v55  ;;  %v1478_v60 = vsel %vm3099_vm6, %v2215_v53, %v2204_v51  ;;  %v1475_v4 = vsel %vm3100_vm7, %v2214_v54, %v2209_v46  ;;  %v2218_v61 = vpop.permute.xlu0 %2217 }
 0x67b   : > { %v1975_v16 = vpack.c.bf16 %v1478_v60, %v1475_v4  ;;  %v2220_v6 = vunpack.i.h.bf16 %v2218_v61  ;;  %v2219_v17 = vunpack.i.l.bf16 %v2218_v61  ;;  %1913 = vmatmul.mubr.msk.f32.vlgmr.msra.gmra.mrb[2].mxu1 %vm431_vm12, %v1100_v47 }
 0x67c   : > { %1974 = vmatprep.subr.msk.bf16.mxu0 %vm2752_vm13, %v1972_v57  ;;  %1919 = vmatprep.mubr.msk.f32.mxu1 %vm2411_vm0, %v2408_v10 }
 0x67d   : > { %v1477_v62 = vsel %vm3101_vm8, %v2210_v45, %v2219_v17  ;;  %v1480_v11 = vsel %vm3102_vm9, %v2205_v50, %v2220_v6  ;;  %1977 = vmatpush1.bf16.msk.msra.mxu0 %vm2752_vm13, %v1975_v16 }
 0x67e   : > { %v1979_v20 = vpack.c.bf16 %v1480_v11, %v1477_v62 }
 0x680   : > { %1856 = vmatmul.mubr.msk.f32.vlgmr.msra.gmra.mrb[2].mxu0 %vm431_vm12, %v1458_v63  ;;  %1981 = vmatpush3.bf16.msk.msra.mxu1 %vm2752_vm13, %v1979_v20 }
 0x683   : > { %1920 = vmatmul.mubr.msk.f32.vlgmr.msra.gmra.mrb[2].mxu1 %vm431_vm12, %v1458_v63  ;;  %vm3103_vm12 = vcmask 187392  }
 0x684   : > { %vm3104_vm13 = vmmov %vm3103_vm12 }
 0x753   : > { %v1559_v21 = vpop.f32.mrb[2].mxu0 }
 0x754   : > { %v1637_v10 = vsel %vm2813_vm15, %v1559_v21, 0.0  ;;  %v1561_v0 = vpop.f32.mrb[3].mxu0 }
 0x755   : > { %v1640_v1 = vsel %vm393_vm14, %v1637_v10, 0.0  ;;  %v1638_v2 = vsel %vm2817_vm11, %v1561_v0, 0.0 }
 0x756   : > { %v1641_v3 = vsel %vm393_vm14, %v1638_v2, 0.0  ;;  %v1630_v9 = vpop.f32.mrb[2].mxu1 }
 0x757   : > { %v1642_v13 = vadd.f32 %v1641_v3, %v1640_v1  ;;  %v1639_v44 = vsel %vm2823_vm1, %v1630_v9, 0.0  ;;  %v1921_v33 = vpop.f32.mrb[3].mxu1 }
 0x758   : > { %v1643_v14 = vsel %vm393_vm14, %v1639_v44, 0.0 }
 0x759   : > { %v1644_v15 = vadd.f32 %v1643_v14, %v1642_v13 }
 0x75b   : > { %1645 = vadd.xlane.f32.xlu1 %v1644_v15 }
 0x7e8   : > { %v1646_v34 = vpop.xlane.xlu1 %1645 }
 0x7e9   : > { %v1647_v39 = vmul.f32 0.00390625, %v1646_v34 }
 0x7eb   : > { %v1648_v18 = vsub.f32 %v1559_v21, %v1647_v39  ;;  %v1649_v40 = vsub.f32 %v1561_v0, %v1647_v39  ;;  %v1650_v19 = vsub.f32 %v1630_v9, %v1647_v39 }
 0x7ed   : > { %v1651_v22 = vsel %vm2813_vm15, %v1648_v18, 0.0  ;;  %v1652_v23 = vsel %vm2817_vm11, %v1649_v40, 0.0  ;;  %v1653_v24 = vsel %vm2823_vm1, %v1650_v19, 0.0  ;;  %vm1682_vm11 = vcmask 859136  }
 0x7ee   : > { %v1654_v25 = vmul.f32 %v1651_v22, %v1651_v22  ;;  %v1655_v27 = vmul.f32 %v1652_v23, %v1652_v23  ;;  %v1656_v28 = vmul.f32 %v1653_v24, %v1653_v24 }
 0x7f0   : > { %v1657_v29 = vsel %vm393_vm14, %v1654_v25, 0.0  ;;  %v1658_v30 = vsel %vm393_vm14, %v1655_v27, 0.0  ;;  %v1660_v32 = vsel %vm393_vm14, %v1656_v28, 0.0 }
 0x7f1   : > { %v1659_v31 = vadd.f32 %v1658_v30, %v1657_v29 }
 0x7f3   : > { %v1661_v35 = vadd.f32 %v1660_v32, %v1659_v31 }
 0x7f5   : > { %1662 = vadd.xlane.f32.xlu0 %v1661_v35 }
 0x882   : > { %v1663_v58 = vpop.xlane.xlu0 %1662 }
 0x883   : > { %v1664_v36 = vmul.f32 0.00390625, %v1663_v58 }
 0x885   : > { %v1665_v37 = vadd.f32 1e-05, %v1664_v36 }
 0x887   : > { %2232 = vrsqrt.f32 %v1665_v37 }
 0x891   : > { %v2233_v59 = vpop.eup %2232 }
 0x892   : > { %v1668_v38 = vmul.f32 %v2233_v59, %v1649_v40  ;;  %v1667_v7 = vmul.f32 %v2233_v59, %v1648_v18  ;;  %v1669_v43 = vmul.f32 %v2233_v59, %v1650_v19 }
 0x894   : > { %v1674_v41 = vrot.slane %v1668_v38, 4  ;;  %v1673_v42 = vrot.slane %v1667_v7, 4  ;;  %v1675_v45 = vrot.slane %v1669_v43, 4 }
 0x896   : > { %1678 = vrot.lane.b32.xlu1 %v1674_v41, %s2415_s12  ;;  %1676 = vrot.lane.b32.xlu0 %v1673_v42, %s2415_s12 }
 0x89a   : > { %1680 = vrot.lane.b32.xlu1 %v1675_v45, %s2415_s12 }
 0x908   : > { %v1679_v46 = vpop.permute.xlu1 %1678  ;;  %v1677_v47 = vpop.permute.xlu0 %1676 }
 0x909   : > { %v1683_v48 = vsel %vm1682_vm11, %v1677_v47, %v1679_v46  ;;  %v1689_v49 = vadd.f32 %v1677_v47, %v2724_v12 }
 0x90a   : > { %v1690_v50 = vadd.f32 %v1683_v48, %v2714_v5 }
 0x90b   : > { %v1693_v51 = vmax.f32 %v1689_v49, 0.0 }
 0x90c   : > { %v1694_v52 = vmax.f32 %v1690_v50, 0.0  ;;  %v1681_v53 = vpop.permute.xlu1 %1680 }
 0x90d   : > { %v1684_v54 = vsel %vm1682_vm11, %v1679_v46, %v1681_v53  ;;  %v1692_v55 = vadd.f32 %v1681_v53, %v2735_v26 }
 0x90e   : > { %v1691_v56 = vadd.f32 %v1684_v54, %v2717_v8  ;;  %v1701_v57 = vcombine.high %v1693_v51, %v1694_v52 }
 0x90f   : > { %v1696_v60 = vmax.f32 %v1692_v55, 0.0 }
 0x910   : > { %v1695_v4 = vmax.f32 %v1691_v56, 0.0  ;;  %1703 = vrot.lane.b32.xlu0 %v1701_v57, %s2410_s28 }
 0x912   : > { %v1702_v61 = vcombine.high %v1695_v4, %v1696_v60 }
 0x914   : > { %1705 = vrot.lane.b32.xlu1 %v1702_v61, %s2410_s28 }
 0x982   : > { %v1704_v12 = vpop.permute.xlu0 %1703 }
 0x983   : > { %v1707_v16 = vrot.slane %v1704_v12, 4 }
 0x986   : > { %v1706_v5 = vpop.permute.xlu1 %1705 }
 0x987   : > { %v1708_v26 = vrot.slane %v1706_v5, 4 }
 0x989   : > { %v1709_v8 = vsel %vm393_vm14, %v1707_v16, %v1708_v26  ;;  %v1711_v6 = vsel %vm3103_vm12, %v1706_v5, %v1708_v26 }
 0x98a   : > { %v1710_v17 = vsel %vm3104_vm13, %v1704_v12, %v1709_v8  ;;  %1715 = vst [vmem:[%s242_s7 + $0x8] sm:$0xf] %v1711_v6 }
 0x98b   : > { %1714 = vst [vmem:[%s242_s7] sm:$0xff] %v1710_v17 }
 0x98c   : > { %2337 = shalt.err (!%p2334_p2)
}
 0x98d   : > { %s2338_s30 = scalar_lea.hbm %s2987_s21, 192  ;;  %s2342_s28 = scalar_lea.hbm %s3036_s4, 384 }
 0x98e   : > { %p2339_p13 = scmp.ne.s32.totalorder %s2987_s21, %s2338_s30  ;;  %p2343_p4 = scmp.lt.u32.totalorder %s2987_s21, %s3036_s4 }
 0x98f   : > { %p2344_p5 = scmp.lt.u32.totalorder %s2342_s28, %s2338_s30  ;;  %p2346_p11 = scmp.lt.u32.totalorder %s2338_s30, %s2987_s21 }
 0x990   : > { %p2340_p6 = pnand %p2339_p13, %p3105_p0 }
 0x991   : > { %p2345_p8 = por %p2344_p5, %p2343_p4 }
 0x992   : > { %p2341_p10 = pneg %p2340_p6 }
 0x993   : > { %p2347_p1 = por %p2346_p11, %p2345_p8 }
 0x995   : > { %p2348_p3 = pnand %p2347_p1, %p2341_p10 }
 0x997   : > { %2351 = shalt.err (!%p2348_p3)
}
 0x998   : > { %2012 = dma.vmem_to_hbm [thread:$0]  (%p3105_p0), %s2989_s8, 192, %s2987_s21, %s1717_s19  }
 0x999 PF: > { %s1743_s12 = sand.u32 1, %s2382_s15   ;;  %p3106_p7 = scmp.ne.s32.totalorder %s3048_s22, 0 }
 0x99a   : > { %p3107_p9 = scmp.ge.s32.totalorder %s2394_s18, 2  ;;  %s1744_s27 = scalar_lea.sflag [#allocation5], %s1743_s12 }
 0x99c   : > { %p2026_p12 = pnand %p3107_p9, %p3106_p7 }
 0x99e   : > { %2377 = dma.done.wait (!%p2026_p12), %s1744_s27, 192  }
 0x99f   : > { %2379 = vsyncadd (!%p2026_p12), %s1744_s27, 4294967104  ;;  %p18_p2 = scmp.ge.s32.totalorder %s2552_s9, 4   ;;  %s3108_s15 = smov %s2386_s16 }
 0x9a0   : > { %s3109_s16 = smov %s2390_s17  ;;  %s3110_s17 = smov %s2568_s14 }
 0x9a1   : > { %s3111_s18 = smov %s2552_s9  ;;  %20 = sbr.rel (!%p18_p2) target bundleno = 6 (0x6), region = 93 }
 0x9a8   :  { %1749 = vsyncpa [#allocation4], 1 }
 0x9a9   :  { %1751 = vsyncpa [#allocation4 + $0x1], 1 }
 0x9aa   :  { %1752 = vsyncpa [#allocation7], 1 }
 0x9ab   :  { %1753 = vsyncpa [#allocation5], 1 }
 0x9ac   :  { %1755 = vsyncpa [#allocation5 + $0x1], 1 }

</bundles_post_ra>
